<compile_context>
chip_gen: v5e
topology: v5e:2x2
jax: 0.10.0
libtpu: 0.0.40
codegen_flags: <defaults>
</compile_context>

<pallas_src>
import jax
import jax.numpy as jnp
from jax.experimental import pallas as pl
from jax.experimental.pallas import tpu as pltpu

LATENT_DIM = 2
HIDDEN_1 = 512          # HIDDEN_LAYER_SIZE_1
HIDDEN_2 = 256          # HIDDEN_LAYER_SIZE_2
MNIST_INPUT_SIZE = 784
PADDED_OUT = 896        # 7 * 128 -> lane-dense MXU compute; stores are 784 wide


def _round_up(x, m):
    return ((x + m - 1) // m) * m


def decoder_kernel(z_ref, w1_ref, b1_ref, w2_ref, b2_ref, w3_ref, b3_ref, o_ref):
    # ---- Layer 1: K = 2 contraction -> VPU broadcast-FMA (keeps MXU free) ----
    z = z_ref[...]                                         # (TB, 2) f32
    h1 = (z[:, 0:1] * w1_ref[0:1, :]
          + z[:, 1:2] * w1_ref[1:2, :]
          + b1_ref[...])                                   # (TB, 256) f32
    h1 = jnp.maximum(h1, 0.0)

    # ---- Layer 2: bf16 inputs on the MXU, f32 accumulate -----------------------
    h2 = jnp.dot(h1.astype(jnp.bfloat16), w2_ref[...],
                 preferred_element_type=jnp.float32)       # (TB, 512) f32
    h2 = jnp.maximum(h2 + b2_ref[...], 0.0)

    # ---- Layer 3: bf16 inputs on the MXU, f32 accumulate, 896-wide compute -----
    logits = jnp.dot(h2.astype(jnp.bfloat16), w3_ref[...],
                     preferred_element_type=jnp.float32)   # (TB, 896) f32
    logits = (logits + b3_ref[...])[:, :MNIST_INPUT_SIZE]  # drop padded columns

    # ---- Sigmoid: single EUP pass via tanh; scale/offset on the VPU ------------
    sig = 0.5 * (jnp.tanh(0.5 * logits) + 1.0)             # f32 math (v5e-safe)
    o_ref[...] = sig.astype(jnp.bfloat16)                  # bf16 writeback


def prepare_params(params):
    """One-time weight preparation (hoisted out of the per-call path)."""
    w1, b1, w2, b2, w3, b3 = params
    w2 = w2.astype(jnp.bfloat16)
    w3p = jnp.pad(w3.astype(jnp.bfloat16),
                  ((0, 0), (0, PADDED_OUT - MNIST_INPUT_SIZE)))
    b3p = jnp.pad(b3, ((0, 0), (0, PADDED_OUT - MNIST_INPUT_SIZE)))
    return w1, b1, w2, b2, w3p, b3p


def variational_decoder(z, prepared_params, *, block_b=512):
    """z: (B, 2) f32; prepared_params from prepare_params(). Returns (B, 784) bf16."""
    w1, b1, w2, b2, w3p, b3p = prepared_params
    B = z.shape[0]

    # Batch tile: multiple of 16 (bf16 sublane packing); prefer >= 2 grid steps
    # when the batch allows it so the "parallel" axis can shard over v7x's 2 TCs.
    b_req = _round_up(B, 16)
    tb = min(block_b, b_req)
    if b_req // tb < 2 and b_req >= 32:
        tb = _round_up(pl.cdiv(b_req, 2), 16)
    b_pad = _round_up(B, tb)

    zp = jnp.pad(z, ((0, b_pad - B), (0, 0))) if b_pad != B else z

    const = lambda i: (0, 0)   # weights/biases: same block every step -> resident

    flops = 2 * b_pad * (LATENT_DIM * HIDDEN_2
                         + HIDDEN_2 * HIDDEN_1
                         + HIDDEN_1 * PADDED_OUT)
    bytes_accessed = (zp.size * 4 + w1.size * 4 + b1.size * 4
                      + w2.size * 2 + b2.size * 4
                      + w3p.size * 2 + b3p.size * 4
                      + b_pad * MNIST_INPUT_SIZE * 2)       # bf16 output

    out = pl.pallas_call(
        decoder_kernel,
        out_shape=jax.ShapeDtypeStruct((b_pad, MNIST_INPUT_SIZE), jnp.bfloat16),
        grid=(b_pad // tb,),
        in_specs=[
            pl.BlockSpec((tb, LATENT_DIM), lambda i: (i, 0)),      # z tile
            pl.BlockSpec((LATENT_DIM, HIDDEN_2), const),           # W1 (f32)
            pl.BlockSpec((1, HIDDEN_2), const),                    # b1
            pl.BlockSpec((HIDDEN_2, HIDDEN_1), const),             # W2 (bf16)
            pl.BlockSpec((1, HIDDEN_1), const),                    # b2
            pl.BlockSpec((HIDDEN_1, PADDED_OUT), const),           # W3 (bf16, padded)
            pl.BlockSpec((1, PADDED_OUT), const),                  # b3 (padded)
        ],
        # 784 equals the full array dim -> legal block; last vreg group is masked.
        out_specs=pl.BlockSpec((tb, MNIST_INPUT_SIZE), lambda i: (i, 0)),
        compiler_params=pltpu.CompilerParams(
            dimension_semantics=("parallel",)),
        cost_estimate=pl.CostEstimate(
            flops=flops,
            transcendentals=b_pad * MNIST_INPUT_SIZE,              # one tanh / elem
            bytes_accessed=bytes_accessed),
    )(zp, w1, b1, w2, b2, w3p, b3p)

    return out[:B] if b_pad != B else out


def init_params(key):
    # Deterministic init mimicking PyTorch's default Linear init
    # (uniform in [-1/sqrt(fan_in), 1/sqrt(fan_in)]); weights stored (in, out).
    def linear_init(key, fan_in, fan_out):
        kw, kb = jax.random.split(key)
        bound = 1.0 / jnp.sqrt(fan_in)
        w = jax.random.uniform(kw, (fan_in, fan_out), jnp.float32, -bound, bound)
        b = jax.random.uniform(kb, (1, fan_out), jnp.float32, -bound, bound)
        return w, b

    k1, k2, k3 = jax.random.split(key, 3)
    w1, b1 = linear_init(k1, LATENT_DIM, HIDDEN_2)        # (2, 256),   (1, 256)
    w2, b2 = linear_init(k2, HIDDEN_2, HIDDEN_1)          # (256, 512), (1, 512)
    w3, b3 = linear_init(k3, HIDDEN_1, MNIST_INPUT_SIZE)  # (512, 784), (1, 784)
    return w1, b1, w2, b2, w3, b3


def reference_decoder(z, params):
    # Pure-JAX reference matching the kernel's numeric contract
    # (f32 layer 1, bf16-weight / f32-accumulate layers 2 & 3, exact f32 sigmoid).
    w1, b1, w2, b2, w3, b3 = params
    h1 = jax.nn.relu(z @ w1 + b1)
    h2 = jax.nn.relu(
        jnp.dot(h1.astype(jnp.bfloat16), w2.astype(jnp.bfloat16),
                preferred_element_type=jnp.float32) + b2)
    logits = jnp.dot(h2.astype(jnp.bfloat16), w3.astype(jnp.bfloat16),
                     preferred_element_type=jnp.float32) + b3
    return jax.nn.sigmoid(logits)


if __name__ == "__main__":
    key = jax.random.PRNGKey(0)
    kp, kz = jax.random.split(key)

    params = init_params(kp)
    prepared = prepare_params(params)      # one-time bf16 cast + 896-wide padding

    B = 8
    z = jax.random.normal(kz, (B, LATENT_DIM), jnp.float32)

    decode = jax.jit(variational_decoder)
    out = jax.block_until_ready(decode(z, prepared))

    ref = reference_decoder(z, params)
    assert out.shape == (B, MNIST_INPUT_SIZE)
    assert out.dtype == jnp.bfloat16
    # Tolerance covers bf16 MXU inputs + bf16 output quantization of the sigmoid.
    assert jnp.allclose(out.astype(jnp.float32), ref, atol=2e-2, rtol=2e-2), \
        "mismatch vs reference"

    print("KERNEL_OK")
</pallas_src>

<mosaic_0001>
module attributes {stable_mosaic.version = 11 : i64} {
  func.func @decoder_kernel(%arg0: i32, %arg1: memref<16x2xf32, #tpu.memory_space<vmem>>, %arg2: memref<2x256xf32, #tpu.memory_space<vmem>>, %arg3: memref<1x256xf32, #tpu.memory_space<vmem>>, %arg4: memref<256x512xbf16, #tpu.memory_space<vmem>>, %arg5: memref<1x512xf32, #tpu.memory_space<vmem>>, %arg6: memref<512x896xbf16, #tpu.memory_space<vmem>>, %arg7: memref<1x896xf32, #tpu.memory_space<vmem>>, %arg8: memref<16x784xbf16, #tpu.memory_space<vmem>>) attributes {dimension_semantics = [#tpu.dimension_semantics<parallel>], iteration_bounds = array<i64: 1>, scalar_prefetch = 0 : i64, scratch_operands = 0 : i64, tpu.core_type = #tpu.core_type<tc>, window_params = [{transform_indices = @transform_0, window_bounds = array<i64: 16, 2>}, {pipeline_mode = #tpu.pipeline_mode<synchronous>, transform_indices = @transform_1, window_bounds = array<i64: 2, 256>}, {pipeline_mode = #tpu.pipeline_mode<synchronous>, transform_indices = @transform_2, window_bounds = array<i64: 1, 256>}, {pipeline_mode = #tpu.pipeline_mode<synchronous>, transform_indices = @transform_3, window_bounds = array<i64: 256, 512>}, {pipeline_mode = #tpu.pipeline_mode<synchronous>, transform_indices = @transform_4, window_bounds = array<i64: 1, 512>}, {pipeline_mode = #tpu.pipeline_mode<synchronous>, transform_indices = @transform_5, window_bounds = array<i64: 512, 896>}, {pipeline_mode = #tpu.pipeline_mode<synchronous>, transform_indices = @transform_6, window_bounds = array<i64: 1, 896>}, {transform_indices = @transform_7, window_bounds = array<i64: 16, 784>}]} {
    %c0 = arith.constant 0 : index
    %c0_0 = arith.constant 0 : index
    %0 = vector.load %arg1[%c0, %c0_0] : memref<16x2xf32, #tpu.memory_space<vmem>>, vector<16x2xf32>
    %1 = vector.extract_strided_slice %0 {offsets = [0, 0], sizes = [16, 1], strides = [1, 1]} : vector<16x2xf32> to vector<16x1xf32>
    %c0_1 = arith.constant 0 : index
    %c0_2 = arith.constant 0 : index
    %2 = vector.load %arg2[%c0_1, %c0_2] : memref<2x256xf32, #tpu.memory_space<vmem>>, vector<1x256xf32>
    %3 = vector.broadcast %1 : vector<16x1xf32> to vector<16x256xf32>
    %4 = vector.broadcast %2 : vector<1x256xf32> to vector<16x256xf32>
    %5 = arith.mulf %3, %4 : vector<16x256xf32>
    %6 = vector.extract_strided_slice %0 {offsets = [0, 1], sizes = [16, 1], strides = [1, 1]} : vector<16x2xf32> to vector<16x1xf32>
    %c1 = arith.constant 1 : index
    %c0_3 = arith.constant 0 : index
    %7 = vector.load %arg2[%c1, %c0_3] : memref<2x256xf32, #tpu.memory_space<vmem>>, vector<1x256xf32>
    %8 = vector.broadcast %6 : vector<16x1xf32> to vector<16x256xf32>
    %9 = vector.broadcast %7 : vector<1x256xf32> to vector<16x256xf32>
    %10 = arith.mulf %8, %9 : vector<16x256xf32>
    %11 = arith.addf %5, %10 : vector<16x256xf32>
    %c0_4 = arith.constant 0 : index
    %c0_5 = arith.constant 0 : index
    %12 = vector.load %arg3[%c0_4, %c0_5] : memref<1x256xf32, #tpu.memory_space<vmem>>, vector<1x256xf32>
    %13 = vector.broadcast %12 : vector<1x256xf32> to vector<16x256xf32>
    %14 = arith.addf %11, %13 : vector<16x256xf32>
    %cst = arith.constant 0.000000e+00 : f32
    %15 = vector.broadcast %cst : f32 to vector<16x256xf32>
    %16 = arith.maximumf %14, %15 : vector<16x256xf32>
    %17 = arith.truncf %16 : vector<16x256xf32> to vector<16x256xbf16>
    %c0_6 = arith.constant 0 : index
    %c0_7 = arith.constant 0 : index
    %18 = vector.load %arg4[%c0_6, %c0_7] : memref<256x512xbf16, #tpu.memory_space<vmem>>, vector<256x512xbf16>
    %cst_8 = arith.constant dense<0.000000e+00> : vector<16x512xf32>
    %19 = tpu.matmul %17, %18, %cst_8 {dimension_numbers = #tpu.dot_dimension_numbers<[1], [0], [0], [1], [0, 0, 1, 1], [], []>} : vector<16x256xbf16>, vector<256x512xbf16>, vector<16x512xf32> -> vector<16x512xf32>
    %c0_9 = arith.constant 0 : index
    %c0_10 = arith.constant 0 : index
    %20 = vector.load %arg5[%c0_9, %c0_10] : memref<1x512xf32, #tpu.memory_space<vmem>>, vector<1x512xf32>
    %21 = vector.broadcast %20 : vector<1x512xf32> to vector<16x512xf32>
    %22 = arith.addf %19, %21 : vector<16x512xf32>
    %cst_11 = arith.constant 0.000000e+00 : f32
    %23 = vector.broadcast %cst_11 : f32 to vector<16x512xf32>
    %24 = arith.maximumf %22, %23 : vector<16x512xf32>
    %25 = arith.truncf %24 : vector<16x512xf32> to vector<16x512xbf16>
    %c0_12 = arith.constant 0 : index
    %c0_13 = arith.constant 0 : index
    %26 = vector.load %arg6[%c0_12, %c0_13] : memref<512x896xbf16, #tpu.memory_space<vmem>>, vector<512x896xbf16>
    %cst_14 = arith.constant dense<0.000000e+00> : vector<16x896xf32>
    %27 = tpu.matmul %25, %26, %cst_14 {dimension_numbers = #tpu.dot_dimension_numbers<[1], [0], [0], [1], [0, 0, 1, 1], [], []>} : vector<16x512xbf16>, vector<512x896xbf16>, vector<16x896xf32> -> vector<16x896xf32>
    %c0_15 = arith.constant 0 : index
    %c0_16 = arith.constant 0 : index
    %28 = vector.load %arg7[%c0_15, %c0_16] : memref<1x896xf32, #tpu.memory_space<vmem>>, vector<1x896xf32>
    %29 = vector.broadcast %28 : vector<1x896xf32> to vector<16x896xf32>
    %30 = arith.addf %27, %29 : vector<16x896xf32>
    %31 = vector.extract_strided_slice %30 {offsets = [0, 0], sizes = [16, 784], strides = [1, 1]} : vector<16x896xf32> to vector<16x784xf32>
    %cst_17 = arith.constant 5.000000e-01 : f32
    %32 = vector.broadcast %cst_17 : f32 to vector<16x784xf32>
    %33 = arith.mulf %32, %31 : vector<16x784xf32>
    %34 = math.tanh %33 : vector<16x784xf32>
    %cst_18 = arith.constant 1.000000e+00 : f32
    %35 = vector.broadcast %cst_18 : f32 to vector<16x784xf32>
    %36 = arith.addf %34, %35 : vector<16x784xf32>
    %cst_19 = arith.constant 5.000000e-01 : f32
    %37 = vector.broadcast %cst_19 : f32 to vector<16x784xf32>
    %38 = arith.mulf %37, %36 : vector<16x784xf32>
    %39 = arith.truncf %38 : vector<16x784xf32> to vector<16x784xbf16>
    %c0_20 = arith.constant 0 : index
    %c0_21 = arith.constant 0 : index
    %40 = vector.load %arg8[%c0_20, %c0_21] : memref<16x784xbf16, #tpu.memory_space<vmem>>, vector<16x784xbf16>
    tpu.vector_store %arg8[%c0_20, %c0_21], %39 {strides = array<i32>} : memref<16x784xbf16, #tpu.memory_space<vmem>>, vector<16x784xbf16>,
    return
  }
  func.func @transform_0(%arg0: i32) -> (i32, i32) {
    %c0_i32 = arith.constant 0 : i32
    %c0_i32_0 = arith.constant 0 : i32
    return %arg0, %c0_i32 : i32, i32
  }
  func.func @transform_1(%arg0: i32) -> (i32, i32) {
    %c0_i32 = arith.constant 0 : i32
    %c0_i32_0 = arith.constant 0 : i32
    %c0_i32_1 = arith.constant 0 : i32
    return %c0_i32, %c0_i32_0 : i32, i32
  }
  func.func @transform_2(%arg0: i32) -> (i32, i32) {
    %c0_i32 = arith.constant 0 : i32
    %c0_i32_0 = arith.constant 0 : i32
    %c0_i32_1 = arith.constant 0 : i32
    return %c0_i32, %c0_i32_0 : i32, i32
  }
  func.func @transform_3(%arg0: i32) -> (i32, i32) {
    %c0_i32 = arith.constant 0 : i32
    %c0_i32_0 = arith.constant 0 : i32
    %c0_i32_1 = arith.constant 0 : i32
    return %c0_i32, %c0_i32_0 : i32, i32
  }
  func.func @transform_4(%arg0: i32) -> (i32, i32) {
    %c0_i32 = arith.constant 0 : i32
    %c0_i32_0 = arith.constant 0 : i32
    %c0_i32_1 = arith.constant 0 : i32
    return %c0_i32, %c0_i32_0 : i32, i32
  }
  func.func @transform_5(%arg0: i32) -> (i32, i32) {
    %c0_i32 = arith.constant 0 : i32
    %c0_i32_0 = arith.constant 0 : i32
    %c0_i32_1 = arith.constant 0 : i32
    return %c0_i32, %c0_i32_0 : i32, i32
  }
  func.func @transform_6(%arg0: i32) -> (i32, i32) {
    %c0_i32 = arith.constant 0 : i32
    %c0_i32_0 = arith.constant 0 : i32
    %c0_i32_1 = arith.constant 0 : i32
    return %c0_i32, %c0_i32_0 : i32, i32
  }
  func.func @transform_7(%arg0: i32) -> (i32, i32) {
    %c0_i32 = arith.constant 0 : i32
    %c0_i32_0 = arith.constant 0 : i32
    return %arg0, %c0_i32 : i32, i32
  }
}

</mosaic_0001>

<bundles_post_ra>
// kernel: variational_decoder.1
= control target key start
LH: loop header
LB: loop body
LE: loop exit
PB: predicated region body
PF: predicated region fallthrough
CT: control target
= control target key end

     0   :  { %12 = vsyncpa [#allocation3], 0  ;;  %s4235_s0 = inlined_call_operand.vmem [shape: f32[16,2], index: 0, kind: input, shape index: {}]   ;;  %s4236_s1 = inlined_call_operand.vmem [shape: f32[2,256], index: 1, kind: input, shape index: {}]   ;;  %s4237_s2 = inlined_call_operand.vmem [shape: f32[1,256], index: 2, kind: input, shape index: {}]   ;;  %s4238_s3 = inlined_call_operand.hbm [shape: bf16[256,512], index: 3, kind: input, shape index: {}]   ;;  %s4239_s4 = inlined_call_operand.vmem [shape: f32[1,512], index: 4, kind: input, shape index: {}]   ;;  %s4240_s5 = inlined_call_operand.hbm [shape: bf16[512,896], index: 5, kind: input, shape index: {}]   ;;  %s4241_s6 = inlined_call_operand.vmem [shape: f32[1,896], index: 6, kind: input, shape index: {}]   ;;  %s4242_s7 = inlined_call_operand.vmem [shape: bf16[16,784], index: 7, kind: output, shape index: {}]  }
   0x1   :  { %s24_s26 = sshll.u32 %s4238_s3, 4  ;;  %s25_s26 = int_to_ptr.hbm [resolvable:$true] %s24_s26 }
   0x2   :  { %13 = vsyncpa [#allocation5], 0  ;;  %s4064_s27 = smov [#allocation2]   ;;  %s39_s8 = sshll.u32 %s4240_s5, 4  ;;  %s40_s8 = int_to_ptr.hbm [resolvable:$true] %s39_s8 }
   0x3   :  { %s26_s28 = sshll.u32 %s4064_s27, 4  ;;  %s4065_s9 = smov 256   ;;  %s27_s28 = int_to_ptr.vmem [resolvable:$true] %s26_s28 }
   0x4   :  { %s4066_s10 = smov 16   ;;  %s4067_s11 = smov [#allocation4]  }
   0x5   :  { %32 = dma.hbm_to_vmem [thread:$0]  %s25_s26, 8192, %s27_s28, [#allocation3], %s4065_s9, %s4065_s9, %s4066_s10  }
   0x6   :  { %s41_s12 = sshll.u32 %s4067_s11, 4  ;;  %s4068_s13 = smov 448   ;;  %s42_s12 = int_to_ptr.vmem [resolvable:$true] %s41_s12 }
   0x7   :  { %s4069_s14 = smov 28  }
   0x8   :  { %47 = dma.hbm_to_vmem [thread:$0]  %s40_s8, 28672, %s42_s12, [#allocation5], %s4068_s13, %s4068_s13, %s4069_s14  }
   0x9   :  { %4060 = dma.done.wait [#allocation3], 8192  }
   0xa   :  { %4061 = vsyncadd [#allocation3], 4294959104 }
   0xb   :  { %4062 = dma.done.wait [#allocation5], 28672  }
   0xc   :  { %4063 = vsyncadd [#allocation5], 4294938624  ;;  %v4070_v0 = vmov 1   ;;  %v4071_v1 = vmov 0   ;;  %v58_v2 = vld [vmem:[%s4235_s0] sm:$0xff]  ;;  %v59_v16 = vld [vmem:[%s4235_s0 + $0x8] sm:$0xff] }
   0xd   :  { %3982 = vset.pattern.permute.xlu1 %v4070_v0  ;;  %3981 = vset.pattern.permute.xlu0 %v4071_v1  ;;  %v2647_v3 = vld [vmem:[#allocation2 + $0xe0] sm:$0xf]  ;;  %v3715_v4 = vld [vmem:[#allocation2 + $0xec] sm:$0xf0]  ;;  %v3713_v9 = vld [vmem:[#allocation2 + $0xe4] sm:$0xf] }
   0xe   :  { %83 = vperm.xlu1 %3982, %v58_v2   ;;  %63 = vperm.xlu0 %3981, %v58_v2   ;;  %v2775_v5 = vld [vmem:[#allocation2 + $0x1e0] sm:$0xf]  ;;  %v3747_v6 = vld [vmem:[#allocation2 + $0x1ec] sm:$0xf0]  ;;  %v2648_v7 = vor.u32 %v3715_v4, %v2647_v3  ;;  %v2649_v10 = vld [vmem:[#allocation2 + $0xf0] sm:$0xf0] }
   0xf   :  { %v2776_v8 = vor.u32 %v3747_v6, %v2775_v5  ;;  %v3745_v11 = vld [vmem:[#allocation2 + $0x1e4] sm:$0xf]  ;;  %v2652_v12 = vor.u32 %v3713_v9, %v2649_v10  ;;  %v2777_v13 = vld [vmem:[#allocation2 + $0x1f0] sm:$0xf0]  ;;  %v2631_v14 = vld [vmem:[#allocation2 + $0xc0] sm:$0xf] }
  0x10   :  { %v3711_v15 = vld [vmem:[#allocation2 + $0xcc] sm:$0xf0]  ;;  %513 = vmatpush.bf16.msra.mxu0 %v2648_v7  ;;  %v2780_v17 = vor.u32 %v3745_v11, %v2777_v13  ;;  %v2759_v19 = vld [vmem:[#allocation2 + $0x1c0] sm:$0xf]  ;;  %v3709_v21 = vld [vmem:[#allocation2 + $0xc4] sm:$0xf] }
  0x11   :  { %527 = vmatpush.bf16.msra.mxu1 %v2776_v8  ;;  %v2632_v18 = vor.u32 %v3711_v15, %v2631_v14  ;;  %v3743_v20 = vld [vmem:[#allocation2 + $0x1cc] sm:$0xf0]  ;;  %541 = vmatpush.bf16.msra.mxu2 %v2652_v12  ;;  %v2633_v23 = vld [vmem:[#allocation2 + $0xd0] sm:$0xf0]  ;;  %v3741_v24 = vld [vmem:[#allocation2 + $0x1c4] sm:$0xf] }
  0x12   :  { %v2760_v22 = vor.u32 %v3743_v20, %v2759_v19  ;;  %v2761_v25 = vld [vmem:[#allocation2 + $0x1d0] sm:$0xf0]  ;;  %555 = vmatpush.bf16.msra.mxu3 %v2780_v17  ;;  %v2636_v26 = vor.u32 %v3709_v21, %v2633_v23  ;;  %v2615_v28 = vld [vmem:[#allocation2 + $0xa0] sm:$0xf]  ;;  %v3707_v29 = vld [vmem:[#allocation2 + $0xac] sm:$0xf0] }
  0x13   :  { %v2764_v27 = vor.u32 %v3741_v24, %v2761_v25  ;;  %v2743_v30 = vld [vmem:[#allocation2 + $0x1a0] sm:$0xf]  ;;  %v3739_v31 = vld [vmem:[#allocation2 + $0x1ac] sm:$0xf0]  ;;  %v3705_v32 = vld [vmem:[#allocation2 + $0xa4] sm:$0xf]  ;;  %v2616_v34 = vor.u32 %v3707_v29, %v2615_v28 }
  0x14   :  { %v2617_v33 = vld [vmem:[#allocation2 + $0xb0] sm:$0xf0]  ;;  %514 = vmatpush.bf16.msra.mxu0 %v2632_v18  ;;  %v2744_v35 = vor.u32 %v3739_v31, %v2743_v30  ;;  %v3737_v36 = vld [vmem:[#allocation2 + $0x1a4] sm:$0xf]  ;;  %v2599_v38 = vld [vmem:[#allocation2 + $0x80] sm:$0xf] }
  0x15   :  { %528 = vmatpush.bf16.msra.mxu1 %v2760_v22  ;;  %v2745_v37 = vld [vmem:[#allocation2 + $0x1b0] sm:$0xf0]  ;;  %v3703_v39 = vld [vmem:[#allocation2 + $0x8c] sm:$0xf0]  ;;  %v2727_v40 = vld [vmem:[#allocation2 + $0x180] sm:$0xf]  ;;  %542 = vmatpush.bf16.msra.mxu2 %v2636_v26  ;;  %v2620_v42 = vor.u32 %v3705_v32, %v2617_v33 }
  0x16   :  { %87 = vperm.xlu1 %3982, %v59_v16   ;;  %68 = vperm.xlu0 %3981, %v59_v16   ;;  %v3735_v41 = vld [vmem:[#allocation2 + $0x18c] sm:$0xf0]  ;;  %v2748_v43 = vor.u32 %v3737_v36, %v2745_v37  ;;  %v3701_v44 = vld [vmem:[#allocation2 + $0x84] sm:$0xf]  ;;  %v2601_v45 = vld [vmem:[#allocation2 + $0x90] sm:$0xf0]  ;;  %v2600_v48 = vor.u32 %v3703_v39, %v2599_v38 }
  0x17   :  { %556 = vmatpush.bf16.msra.mxu3 %v2764_v27  ;;  %v3733_v46 = vld [vmem:[#allocation2 + $0x184] sm:$0xf]  ;;  %v2729_v47 = vld [vmem:[#allocation2 + $0x190] sm:$0xf0]  ;;  %v2728_v49 = vor.u32 %v3735_v41, %v2727_v40  ;;  %v2583_v50 = vld [vmem:[#allocation2 + $0x60] sm:$0xf]  ;;  %v2604_v54 = vor.u32 %v3701_v44, %v2601_v45 }
  0x18   :  { %515 = vmatpush.bf16.msra.mxu0 %v2616_v34  ;;  %v3699_v51 = vld [vmem:[#allocation2 + $0x6c] sm:$0xf0]  ;;  %v2711_v52 = vld [vmem:[#allocation2 + $0x160] sm:$0xf]  ;;  %v2732_v55 = vor.u32 %v3733_v46, %v2729_v47  ;;  %v3697_v56 = vld [vmem:[#allocation2 + $0x64] sm:$0xf] }
  0x19   :  { %529 = vmatpush.bf16.msra.mxu1 %v2744_v35  ;;  %v3731_v53 = vld [vmem:[#allocation2 + $0x16c] sm:$0xf0]  ;;  %543 = vmatpush.bf16.msra.mxu2 %v2620_v42  ;;  %v2585_v57 = vld [vmem:[#allocation2 + $0x70] sm:$0xf0]  ;;  %v3729_v58 = vld [vmem:[#allocation2 + $0x164] sm:$0xf]  ;;  %v2584_v60 = vor.u32 %v3699_v51, %v2583_v50 }
  0x1a   :  { %v2713_v59 = vld [vmem:[#allocation2 + $0x170] sm:$0xf0]  ;;  %v2712_v61 = vor.u32 %v3731_v53, %v2711_v52  ;;  %v2567_v62 = vld [vmem:[#allocation2 + $0x40] sm:$0xf]  ;;  %v3695_v63 = vld [vmem:[#allocation2 + $0x4c] sm:$0xf0]  ;;  %v2588_v3 = vor.u32 %v3697_v56, %v2585_v57 }
  0x1b   :  { %557 = vmatpush.bf16.msra.mxu3 %v2748_v43  ;;  %v2695_v1 = vld [vmem:[#allocation2 + $0x140] sm:$0xf]  ;;  %v3727_v2 = vld [vmem:[#allocation2 + $0x14c] sm:$0xf0]  ;;  %v2716_v4 = vor.u32 %v3729_v58, %v2713_v59  ;;  %v3693_v5 = vld [vmem:[#allocation2 + $0x44] sm:$0xf]  ;;  %v2568_v9 = vor.u32 %v3695_v63, %v2567_v62 }
  0x1c   :  { %516 = vmatpush.bf16.msra.mxu0 %v2600_v48  ;;  %v2569_v6 = vld [vmem:[#allocation2 + $0x50] sm:$0xf0]  ;;  %v3725_v7 = vld [vmem:[#allocation2 + $0x144] sm:$0xf]  ;;  %v2696_v10 = vor.u32 %v3727_v2, %v2695_v1  ;;  %v2551_v11 = vld [vmem:[#allocation2 + $0x20] sm:$0xf] }
  0x1d   :  { %530 = vmatpush.bf16.msra.mxu1 %v2728_v49  ;;  %544 = vmatpush.bf16.msra.mxu2 %v2604_v54  ;;  %v2697_v8 = vld [vmem:[#allocation2 + $0x150] sm:$0xf0]  ;;  %v3691_v12 = vld [vmem:[#allocation2 + $0x2c] sm:$0xf0]  ;;  %v2679_v13 = vld [vmem:[#allocation2 + $0x120] sm:$0xf]  ;;  %v2572_v15 = vor.u32 %v3693_v5, %v2569_v6 }
  0x1e   :  { %3983 = vset.pattern.permute.xlu0 %v4070_v0  ;;  %v3723_v14 = vld [vmem:[#allocation2 + $0x12c] sm:$0xf0]  ;;  %v2700_v0 = vor.u32 %v3725_v7, %v2697_v8  ;;  %v3689_v16 = vld [vmem:[#allocation2 + $0x24] sm:$0xf]  ;;  %v2553_v17 = vld [vmem:[#allocation2 + $0x30] sm:$0xf0]  ;;  %v2552_v20 = vor.u32 %v3691_v12, %v2551_v11 }
  0x1f   :  { %558 = vmatpush.bf16.msra.mxu3 %v2732_v55  ;;  %v3721_v18 = vld [vmem:[#allocation2 + $0x124] sm:$0xf]  ;;  %v2681_v19 = vld [vmem:[#allocation2 + $0x130] sm:$0xf0]  ;;  %v2680_v21 = vor.u32 %v3723_v14, %v2679_v13  ;;  %v2556_v22 = vor.u32 %v3689_v16, %v2553_v17  ;;  %v2535_v24 = vld [vmem:[#allocation2] sm:$0xf] }
  0x20   :  { %517 = vmatpush.bf16.msra.mxu0 %v2584_v60  ;;  %v2684_v23 = vor.u32 %v3721_v18, %v2681_v19  ;;  %v3687_v25 = vld [vmem:[#allocation2 + $0xc] sm:$0xf0]  ;;  %v2663_v26 = vld [vmem:[#allocation2 + $0x100] sm:$0xf]  ;;  %v3685_v29 = vld [vmem:[#allocation2 + $0x4] sm:$0xf] }
  0x21   :  { %531 = vmatpush.bf16.msra.mxu1 %v2712_v61  ;;  %545 = vmatpush.bf16.msra.mxu2 %v2588_v3  ;;  %v2536_v27 = vor.u32 %v3687_v25, %v2535_v24  ;;  %v3719_v28 = vld [vmem:[#allocation2 + $0x10c] sm:$0xf0]  ;;  %v2537_v31 = vld [vmem:[#allocation2 + $0x10] sm:$0xf0]  ;;  %v3717_v32 = vld [vmem:[#allocation2 + $0x104] sm:$0xf] }
  0x22   :  { %v2664_v30 = vor.u32 %v3719_v28, %v2663_v26  ;;  %v2540_v33 = vor.u32 %v3685_v29, %v2537_v31  ;;  %v2665_v34 = vld [vmem:[#allocation2 + $0x110] sm:$0xf0]  ;;  %v2655_v35 = vld [vmem:[#allocation2 + $0xe8] sm:$0xf]  ;;  %v3716_v36 = vld [vmem:[#allocation2 + $0xf4] sm:$0xf0] }
  0x23   :  { %559 = vmatpush.bf16.msra.mxu3 %v2716_v4  ;;  %v2668_v37 = vor.u32 %v3717_v32, %v2665_v34  ;;  %v2656_v38 = vor.u32 %v3716_v36, %v2655_v35  ;;  %v2783_v39 = vld [vmem:[#allocation2 + $0x1e8] sm:$0xf]  ;;  %v3748_v40 = vld [vmem:[#allocation2 + $0x1f4] sm:$0xf0]  ;;  %v3714_v41 = vld [vmem:[#allocation2 + $0xec] sm:$0xf] }
  0x24   :  { %518 = vmatpush.bf16.msra.mxu0 %v2568_v9  ;;  %v2784_v42 = vor.u32 %v3748_v40, %v2783_v39  ;;  %v2657_v43 = vld [vmem:[#allocation2 + $0xf8] sm:$0xf0]  ;;  %v3746_v44 = vld [vmem:[#allocation2 + $0x1ec] sm:$0xf]  ;;  %v2639_v48 = vld [vmem:[#allocation2 + $0xc8] sm:$0xf] }
  0x25   :  { %532 = vmatpush.bf16.msra.mxu1 %v2696_v10  ;;  %546 = vmatpush.bf16.msra.mxu2 %v2572_v15  ;;  %v2785_v45 = vld [vmem:[#allocation2 + $0x1f8] sm:$0xf0]  ;;  %v2660_v46 = vor.u32 %v3714_v41, %v2657_v43  ;;  %v3712_v49 = vld [vmem:[#allocation2 + $0xd4] sm:$0xf0]  ;;  %v2767_v50 = vld [vmem:[#allocation2 + $0x1c8] sm:$0xf] }
  0x26   :  { %v2788_v47 = vor.u32 %v3746_v44, %v2785_v45  ;;  %v2640_v51 = vor.u32 %v3712_v49, %v2639_v48  ;;  %v3744_v52 = vld [vmem:[#allocation2 + $0x1d4] sm:$0xf0]  ;;  %v3710_v53 = vld [vmem:[#allocation2 + $0xcc] sm:$0xf]  ;;  %v2641_v54 = vld [vmem:[#allocation2 + $0xd8] sm:$0xf0] }
  0x27   :  { %560 = vmatpush.bf16.msra.mxu3 %v2700_v0  ;;  %v2768_v55 = vor.u32 %v3744_v52, %v2767_v50  ;;  %v2644_v56 = vor.u32 %v3710_v53, %v2641_v54  ;;  %v3742_v57 = vld [vmem:[#allocation2 + $0x1cc] sm:$0xf]  ;;  %v2769_v58 = vld [vmem:[#allocation2 + $0x1d8] sm:$0xf0]  ;;  %v2623_v60 = vld [vmem:[#allocation2 + $0xa8] sm:$0xf] }
  0x28   :  { %519 = vmatpush.bf16.msra.mxu0 %v2552_v20  ;;  %v2772_v59 = vor.u32 %v3742_v57, %v2769_v58  ;;  %v3708_v61 = vld [vmem:[#allocation2 + $0xb4] sm:$0xf0]  ;;  %v2751_v62 = vld [vmem:[#allocation2 + $0x1a8] sm:$0xf]  ;;  %v3706_v2 = vld [vmem:[#allocation2 + $0xac] sm:$0xf] }
  0x29   :  { %533 = vmatpush.bf16.msra.mxu1 %v2680_v21  ;;  %547 = vmatpush.bf16.msra.mxu2 %v2556_v22  ;;  %v2624_v63 = vor.u32 %v3708_v61, %v2623_v60  ;;  %v3740_v1 = vld [vmem:[#allocation2 + $0x1b4] sm:$0xf0]  ;;  %v2625_v3 = vld [vmem:[#allocation2 + $0xb8] sm:$0xf0]  ;;  %v3738_v5 = vld [vmem:[#allocation2 + $0x1ac] sm:$0xf] }
  0x2a   :  { %v2752_v4 = vor.u32 %v3740_v1, %v2751_v62  ;;  %v2753_v6 = vld [vmem:[#allocation2 + $0x1b8] sm:$0xf0]  ;;  %v2628_v7 = vor.u32 %v3706_v2, %v2625_v3  ;;  %v2607_v9 = vld [vmem:[#allocation2 + $0x88] sm:$0xf]  ;;  %v3704_v10 = vld [vmem:[#allocation2 + $0x94] sm:$0xf0] }
  0x2b   :  { %561 = vmatpush.bf16.msra.mxu3 %v2684_v23  ;;  %v2756_v8 = vor.u32 %v3738_v5, %v2753_v6  ;;  %v2735_v11 = vld [vmem:[#allocation2 + $0x188] sm:$0xf]  ;;  %v2608_v12 = vor.u32 %v3704_v10, %v2607_v9  ;;  %v3736_v13 = vld [vmem:[#allocation2 + $0x194] sm:$0xf0]  ;;  %v3702_v14 = vld [vmem:[#allocation2 + $0x8c] sm:$0xf] }
  0x2c   :  { %520 = vmatpush.bf16.msra.mxu0 %v2536_v27  ;;  %v2609_v15 = vld [vmem:[#allocation2 + $0x98] sm:$0xf0]  ;;  %v2736_v0 = vor.u32 %v3736_v13, %v2735_v11  ;;  %v3734_v16 = vld [vmem:[#allocation2 + $0x18c] sm:$0xf]  ;;  %v2591_v20 = vld [vmem:[#allocation2 + $0x68] sm:$0xf] }
  0x2d   :  { %534 = vmatpush.bf16.msra.mxu1 %v2664_v30  ;;  %548 = vmatpush.bf16.msra.mxu2 %v2540_v33  ;;  %v2737_v17 = vld [vmem:[#allocation2 + $0x198] sm:$0xf0]  ;;  %v2612_v18 = vor.u32 %v3702_v14, %v2609_v15  ;;  %v3700_v21 = vld [vmem:[#allocation2 + $0x74] sm:$0xf0]  ;;  %v2719_v22 = vld [vmem:[#allocation2 + $0x168] sm:$0xf] }
  0x2e   :  { %v2740_v19 = vor.u32 %v3734_v16, %v2737_v17  ;;  %v2592_v23 = vor.u32 %v3700_v21, %v2591_v20  ;;  %v3732_v24 = vld [vmem:[#allocation2 + $0x174] sm:$0xf0]  ;;  %v3698_v25 = vld [vmem:[#allocation2 + $0x6c] sm:$0xf]  ;;  %v2593_v26 = vld [vmem:[#allocation2 + $0x78] sm:$0xf0] }
  0x2f   :  { %562 = vmatpush.bf16.msra.mxu3 %v2668_v37  ;;  %v2720_v27 = vor.u32 %v3732_v24, %v2719_v22  ;;  %v2596_v28 = vor.u32 %v3698_v25, %v2593_v26  ;;  %v3730_v29 = vld [vmem:[#allocation2 + $0x16c] sm:$0xf]  ;;  %v2721_v30 = vld [vmem:[#allocation2 + $0x178] sm:$0xf0]  ;;  %v2575_v31 = vld [vmem:[#allocation2 + $0x48] sm:$0xf] }
  0x30   :  { %569 = vmatpush.bf16.msrb.mxu0 %v2656_v38  ;;  %v2724_v32 = vor.u32 %v3730_v29, %v2721_v30  ;;  %v3696_v33 = vld [vmem:[#allocation2 + $0x54] sm:$0xf0]  ;;  %v2703_v34 = vld [vmem:[#allocation2 + $0x148] sm:$0xf]  ;;  %v3694_v38 = vld [vmem:[#allocation2 + $0x4c] sm:$0xf] }
  0x31   :  { %583 = vmatpush.bf16.msrb.mxu1 %v2784_v42  ;;  %597 = vmatpush.bf16.msrb.mxu2 %v2660_v46  ;;  %v3728_v35 = vld [vmem:[#allocation2 + $0x154] sm:$0xf0]  ;;  %v4129_v36 = vld [vmem:[%s4236_s1 + $0x1] ss:$2 sm:$0x3]  ;;  %v2576_v37 = vor.u32 %v3696_v33, %v2575_v31  ;;  %vm2520_vm0 = vcmask 125952  }
  0x32   :  { %v2577_v39 = vld [vmem:[#allocation2 + $0x58] sm:$0xf0]  ;;  %v3726_v40 = vld [vmem:[#allocation2 + $0x14c] sm:$0xf]  ;;  %v2704_v41 = vor.u32 %v3728_v35, %v2703_v34  ;;  %v2559_v43 = vld [vmem:[#allocation2 + $0x28] sm:$0xf] }
  0x33   :  { %611 = vmatpush.bf16.msrb.mxu3 %v2788_v47  ;;  %v2705_v42 = vld [vmem:[#allocation2 + $0x158] sm:$0xf0]  ;;  %v3692_v44 = vld [vmem:[#allocation2 + $0x34] sm:$0xf0]  ;;  %v2580_v45 = vor.u32 %v3694_v38, %v2577_v39  ;;  %v2687_v47 = vld [vmem:[#allocation2 + $0x128] sm:$0xf] }
  0x34   :  { %570 = vmatpush.bf16.msrb.mxu0 %v2640_v51  ;;  %v2708_v46 = vor.u32 %v3726_v40, %v2705_v42  ;;  %v3724_v48 = vld [vmem:[#allocation2 + $0x134] sm:$0xf0]  ;;  %v3690_v49 = vld [vmem:[#allocation2 + $0x2c] sm:$0xf]  ;;  %v2561_v50 = vld [vmem:[#allocation2 + $0x38] sm:$0xf0]  ;;  %v2560_v54 = vor.u32 %v3692_v44, %v2559_v43 }
  0x35   :  { %584 = vmatpush.bf16.msrb.mxu1 %v2768_v55  ;;  %598 = vmatpush.bf16.msrb.mxu2 %v2644_v56  ;;  %v3722_v51 = vld [vmem:[#allocation2 + $0x12c] sm:$0xf]  ;;  %v2689_v52 = vld [vmem:[#allocation2 + $0x138] sm:$0xf0]  ;;  %v91_v55 = vperm.slane %v4129_v36, 0  ;;  %v2688_v56 = vor.u32 %v3724_v48, %v2687_v47 }
  0x36   :  { %v60_v53 = vld [vmem:[%s4236_s1] ss:$2 sm:$0x3]  ;;  %v2543_v57 = vld [vmem:[#allocation2 + $0x8] sm:$0xf]  ;;  %v2692_v60 = vor.u32 %v3722_v51, %v2689_v52 }
  0x37   :  { %612 = vmatpush.bf16.msrb.mxu3 %v2772_v59  ;;  %v3688_v58 = vld [vmem:[#allocation2 + $0x14] sm:$0xf0]  ;;  %v2564_v59 = vor.u32 %v3690_v49, %v2561_v50  ;;  %v2671_v61 = vld [vmem:[#allocation2 + $0x108] sm:$0xf]  ;;  %v2545_v1 = vld [vmem:[#allocation2 + $0x18] sm:$0xf0] }
  0x38   :  { %571 = vmatpush.bf16.msrb.mxu0 %v2624_v63  ;;  %v3720_v62 = vld [vmem:[#allocation2 + $0x114] sm:$0xf0]  ;;  %v3686_v63 = vld [vmem:[#allocation2 + $0xc] sm:$0xf]  ;;  %v2673_v3 = vld [vmem:[#allocation2 + $0x118] sm:$0xf0] }
  0x39   :  { %585 = vmatpush.bf16.msrb.mxu1 %v2752_v4  ;;  %599 = vmatpush.bf16.msrb.mxu2 %v2628_v7  ;;  %v3718_v2 = vld [vmem:[#allocation2 + $0x10c] sm:$0xf]  ;;  %v92_v4 = vperm.slane %v4129_v36, 1  ;;  %v72_v5 = vperm.slane %v60_v53, 0  ;;  %v73_v6 = vperm.slane %v60_v53, 1  ;;  %v2544_v7 = vor.u32 %v3688_v58, %v2543_v57 }
  0x3a   :  { %v2548_v11 = vor.u32 %v3686_v63, %v2545_v1  ;;  %v103_v16 = vld [vmem:[%s4237_s2] sm:$0x3]  ;;  %v2987_v31 = vld [vmem:[#allocation4 + $0x188] sm:$0xf]  ;;  %v3801_v34 = vld [vmem:[#allocation4 + $0x1a0] sm:$0xf0] }
  0x3b   :  { %613 = vmatpush.bf16.msrb.mxu3 %v2756_v8  ;;  %v2672_v8 = vor.u32 %v3720_v62, %v2671_v61  ;;  %v105_v17 = vperm.slane %v103_v16, 0  ;;  %v3211_v35 = vld [vmem:[#allocation4 + $0x348] sm:$0xf]  ;;  %v3857_v36 = vld [vmem:[#allocation4 + $0x360] sm:$0xf0]  ;;  %v2988_v47 = vor.u32 %v3801_v34, %v2987_v31 }
  0x3c   :  { %572 = vmatpush.bf16.msrb.mxu0 %v2608_v12  ;;  %v2676_v12 = vor.u32 %v3718_v2, %v2673_v3  ;;  %v3435_v39 = vld [vmem:[#allocation4 + $0x508] sm:$0xf]  ;;  %v3913_v40 = vld [vmem:[#allocation4 + $0x520] sm:$0xf0]  ;;  %v2959_v48 = vld [vmem:[#allocation4 + $0x150] sm:$0xf]  ;;  %v3212_v50 = vor.u32 %v3857_v36, %v3211_v35 }
  0x3d   :  { %586 = vmatpush.bf16.msrb.mxu1 %v2736_v0  ;;  %600 = vmatpush.bf16.msrb.mxu2 %v2612_v18  ;;  %v106_v18 = vperm.slane %v103_v16, 1  ;;  %v3659_v43 = vld [vmem:[#allocation4 + $0x6c8] sm:$0xf]  ;;  %v3969_v44 = vld [vmem:[#allocation4 + $0x6e0] sm:$0xf0]  ;;  %v3436_v53 = vor.u32 %v3913_v40, %v3435_v39 }
  0x3e   :  { %v3794_v49 = vld [vmem:[#allocation4 + $0x168] sm:$0xf0]  ;;  %v3183_v51 = vld [vmem:[#allocation4 + $0x310] sm:$0xf]  ;;  %v3787_v61 = vld [vmem:[#allocation4 + $0x130] sm:$0xf0] }
  0x3f   :  { %614 = vmatpush.bf16.msrb.mxu3 %v2740_v19  ;;  %v3850_v52 = vld [vmem:[#allocation4 + $0x328] sm:$0xf0]  ;;  %v3631_v57 = vld [vmem:[#allocation4 + $0x690] sm:$0xf]  ;;  %v3155_v63 = vld [vmem:[#allocation4 + $0x2d8] sm:$0xf] }
  0x40   :  { %573 = vmatpush.bf16.msrb.mxu0 %v2592_v23  ;;  %v3962_v58 = vld [vmem:[#allocation4 + $0x6a8] sm:$0xf0]  ;;  %v3184_v62 = vor.u32 %v3850_v52, %v3183_v51  ;;  %v3843_v1 = vld [vmem:[#allocation4 + $0x2f0] sm:$0xf0]  ;;  %v3379_v3 = vld [vmem:[#allocation4 + $0x498] sm:$0xf] }
  0x41   :  { %587 = vmatpush.bf16.msrb.mxu1 %v2720_v27  ;;  %601 = vmatpush.bf16.msrb.mxu2 %v2596_v28  ;;  %v3892_v16 = vld [vmem:[#allocation4 + $0x478] sm:$0xf0]  ;;  %v3766_v34 = vld [vmem:[#allocation4 + $0x88] sm:$0xf0]  ;;  %v3071_v35 = vld [vmem:[#allocation4 + $0x230] sm:$0xf] }
  0x42   :  { %v3822_v36 = vld [vmem:[#allocation4 + $0x248] sm:$0xf0]  ;;  %v3295_v39 = vld [vmem:[#allocation4 + $0x3f0] sm:$0xf]  ;;  %v3871_v51 = vld [vmem:[#allocation4 + $0x3d0] sm:$0xf0] }
  0x43   :  { %615 = vmatpush.bf16.msrb.mxu3 %v2724_v32  ;;  %v3878_v40 = vld [vmem:[#allocation4 + $0x408] sm:$0xf0] }
  0x44   :  { %574 = vmatpush.bf16.msrb.mxu0 %v2576_v37 }
  0x45   :  { %588 = vmatpush.bf16.msrb.mxu1 %v2704_v41  ;;  %602 = vmatpush.bf16.msrb.mxu2 %v2580_v45 }
  0x47   :  { %616 = vmatpush.bf16.msrb.mxu3 %v2708_v46 }
  0x48   :  { %575 = vmatpush.bf16.msrb.mxu0 %v2560_v54  ;;  %v3407_v54 = vld [vmem:[#allocation4 + $0x4d0] sm:$0xf] }
  0x49   :  { %589 = vmatpush.bf16.msrb.mxu1 %v2688_v56  ;;  %603 = vmatpush.bf16.msrb.mxu2 %v2564_v59  ;;  %v3906_v56 = vld [vmem:[#allocation4 + $0x4e8] sm:$0xf0]  ;;  %v2960_v59 = vor.u32 %v3794_v49, %v2959_v48  ;;  %v3815_v48 = vld [vmem:[#allocation4 + $0x210] sm:$0xf0]  ;;  %v3296_v49 = vor.u32 %v3878_v40, %v3295_v39  ;;  %v3463_v39 = vld [vmem:[#allocation4 + $0x540] sm:$0xf] }
  0x4a   :  { %v3408_v2 = vor.u32 %v3906_v56, %v3407_v54  ;;  %v3808_v56 = vld [vmem:[#allocation4 + $0x1d8] sm:$0xf0] }
  0x4b   :  { %617 = vmatpush.bf16.msrb.mxu3 %v2692_v60  ;;  %v2931_v60 = vld [vmem:[#allocation4 + $0x118] sm:$0xf]  ;;  %v3920_v40 = vld [vmem:[#allocation4 + $0x558] sm:$0xf0] }
  0x4c   :  { %576 = vmatpush.bf16.msrb.mxu0 %v2544_v7  ;;  %v3955_v7 = vld [vmem:[#allocation4 + $0x670] sm:$0xf0] }
  0x4d   :  { %590 = vmatpush.bf16.msrb.mxu1 %v2672_v8  ;;  %604 = vmatpush.bf16.msrb.mxu2 %v2548_v11  ;;  %v2932_v8 = vor.u32 %v3787_v61, %v2931_v60  ;;  %v3156_v11 = vor.u32 %v3843_v1, %v3155_v63  ;;  %v3213_v60 = vld [vmem:[#allocation4 + $0x364] sm:$0xf0]  ;;  %v3791_v1 = vld [vmem:[#allocation4 + $0x154] sm:$0xf] }
  0x4f   :  { %618 = vmatpush.bf16.msrb.mxu3 %v2676_v12  ;;  %v3127_v12 = vld [vmem:[#allocation4 + $0x2a0] sm:$0xf] }
  0x80   :  { %v84_v9 = vpop.permute.xlu1 %83  ;;  %v64_v10 = vpop.permute.xlu0 %63 }
  0x81   :  { %v95_v13 = vmul.f32 %v91_v55, %v84_v9  ;;  %v96_v14 = vmul.f32 %v92_v4, %v84_v9  ;;  %v76_v15 = vmul.f32 %v72_v5, %v64_v10  ;;  %v77_v0 = vmul.f32 %v73_v6, %v64_v10  ;;  %v2903_v9 = vld [vmem:[#allocation4 + $0xe0] sm:$0xf]  ;;  %v3780_v10 = vld [vmem:[#allocation4 + $0xf8] sm:$0xf0] }
  0x83   :  { %v99_v19 = vadd.f32 %v95_v13, %v76_v15  ;;  %v100_v20 = vadd.f32 %v96_v14, %v77_v0  ;;  %v3836_v13 = vld [vmem:[#allocation4 + $0x2b8] sm:$0xf0]  ;;  %v3351_v15 = vld [vmem:[#allocation4 + $0x460] sm:$0xf] }
  0x85   :  { %v109_v27 = vadd.f32 %v105_v17, %v99_v19  ;;  %v110_v28 = vadd.f32 %v106_v18, %v100_v20  ;;  %v2904_v19 = vor.u32 %v3780_v10, %v2903_v9  ;;  %v2875_v20 = vld [vmem:[#allocation4 + $0xa8] sm:$0xf]  ;;  %v2933_v9 = vld [vmem:[#allocation4 + $0x134] sm:$0xf0] }
  0x87   :  { %v113_v37 = vmax.f32 %v109_v27, 0.0  ;;  %v114_v38 = vmax.f32 %v110_v28, 0.0  ;;  %v3885_v28 = vld [vmem:[#allocation4 + $0x440] sm:$0xf0] }
  0x88   :  { %v88_v21 = vpop.permute.xlu1 %87  ;;  %v69_v22 = vpop.permute.xlu0 %68 }
  0x89   :  { %v97_v23 = vmul.f32 %v91_v55, %v88_v21  ;;  %v98_v24 = vmul.f32 %v92_v4, %v88_v21  ;;  %v78_v25 = vmul.f32 %v72_v5, %v69_v22  ;;  %v79_v26 = vmul.f32 %v73_v6, %v69_v22  ;;  %v3899_v5 = vld [vmem:[#allocation4 + $0x4b0] sm:$0xf0]  ;;  %v3603_v6 = vld [vmem:[#allocation4 + $0x658] sm:$0xf]  ;;  %v3773_v21 = vld [vmem:[#allocation4 + $0xc0] sm:$0xf0] }
  0x8a   :  { %v3660_v55 = vor.u32 %v3969_v44, %v3659_v43  ;;  %v3632_v4 = vor.u32 %v3962_v58, %v3631_v57  ;;  %v3380_v14 = vor.u32 %v3899_v5, %v3379_v3  ;;  %v3604_v0 = vor.u32 %v3955_v7, %v3603_v6  ;;  %v3759_v44 = vld [vmem:[#allocation4 + $0x50] sm:$0xf0]  ;;  %v2989_v58 = vld [vmem:[#allocation4 + $0x1a4] sm:$0xf0]  ;;  %v2961_v3 = vld [vmem:[#allocation4 + $0x16c] sm:$0xf0] }
  0x8b   :  { %v101_v29 = vadd.f32 %v97_v23, %v78_v25  ;;  %v102_v30 = vadd.f32 %v98_v24, %v79_v26  ;;  %v3128_v22 = vor.u32 %v3836_v13, %v3127_v12  ;;  %v3099_v23 = vld [vmem:[#allocation4 + $0x268] sm:$0xf]  ;;  %v3829_v24 = vld [vmem:[#allocation4 + $0x280] sm:$0xf0]  ;;  %v3352_v25 = vor.u32 %v3892_v16, %v3351_v15  ;;  %v3185_v5 = vld [vmem:[#allocation4 + $0x32c] sm:$0xf0] }
  0x8c   :  { %v3323_v26 = vld [vmem:[#allocation4 + $0x428] sm:$0xf]  ;;  %v2876_v31 = vor.u32 %v3773_v21, %v2875_v20  ;;  %v3072_v43 = vor.u32 %v3822_v36, %v3071_v35  ;;  %v2964_v6 = vor.u32 %v3791_v1, %v2961_v3  ;;  %v2905_v12 = vld [vmem:[#allocation4 + $0xfc] sm:$0xf0]  ;;  %v3934_v15 = vld [vmem:[#allocation4 + $0x5c8] sm:$0xf0] }
  0x8d   :  { %v111_v32 = vadd.f32 %v105_v17, %v101_v29  ;;  %v112_v33 = vadd.f32 %v106_v18, %v102_v30  ;;  %v3575_v17 = vld [vmem:[#allocation4 + $0x620] sm:$0xf]  ;;  %v3948_v18 = vld [vmem:[#allocation4 + $0x638] sm:$0xf0]  ;;  %v3547_v29 = vld [vmem:[#allocation4 + $0x5e8] sm:$0xf] }
  0x8e   :  { %v3576_v27 = vor.u32 %v3948_v18, %v3575_v17  ;;  %v3941_v30 = vld [vmem:[#allocation4 + $0x600] sm:$0xf0]  ;;  %v3840_v16 = vld [vmem:[#allocation4 + $0x2dc] sm:$0xf]  ;;  %v3157_v17 = vld [vmem:[#allocation4 + $0x2f4] sm:$0xf0] }
  0x8f   :  { %v115_v41 = vmax.f32 %v111_v32, 0.0  ;;  %v116_v42 = vmax.f32 %v112_v33, 0.0  ;;  %v2847_v32 = vld [vmem:[#allocation4 + $0x70] sm:$0xf]  ;;  %v3100_v33 = vor.u32 %v3829_v24, %v3099_v23  ;;  %v3160_v18 = vor.u32 %v3840_v16, %v3157_v17  ;;  %v3864_v20 = vld [vmem:[#allocation4 + $0x398] sm:$0xf0] }
  0x90   :  { %v2877_v23 = vld [vmem:[#allocation4 + $0xc4] sm:$0xf0]  ;;  %v3910_v24 = vld [vmem:[#allocation4 + $0x50c] sm:$0xf]  ;;  %v2849_v35 = vld [vmem:[#allocation4 + $0x8c] sm:$0xf0] }
  0x91   :  { %v4139_v45 = vpack.c.bf16 %v115_v41, %v113_v37  ;;  %v4141_v46 = vpack.c.bf16 %v116_v42, %v114_v38  ;;  %v3324_v37 = vor.u32 %v3885_v28, %v3323_v26  ;;  %v3548_v38 = vor.u32 %v3941_v30, %v3547_v29  ;;  %v2819_v42 = vld [vmem:[#allocation4 + $0x38] sm:$0xf]  ;;  %v3437_v26 = vld [vmem:[#allocation4 + $0x524] sm:$0xf0]  ;;  %v3927_v28 = vld [vmem:[#allocation4 + $0x590] sm:$0xf0] }
  0x92   :  { %v2848_v41 = vor.u32 %v3766_v34, %v2847_v32  ;;  %v2820_v52 = vor.u32 %v3759_v44, %v2819_v42  ;;  %v3440_v29 = vor.u32 %v3910_v24, %v3437_v26  ;;  %v3129_v32 = vld [vmem:[#allocation4 + $0x2bc] sm:$0xf0]  ;;  %v3763_v34 = vld [vmem:[#allocation4 + $0x74] sm:$0xf]  ;;  %v3464_v42 = vor.u32 %v3920_v40, %v3463_v39  ;;  %v3101_v44 = vld [vmem:[#allocation4 + $0x284] sm:$0xf0] }
  0x93   :  { %521 = vmatmul.bf16.vlgmr.msra.gmra.mxu0 %v4139_v45  ;;  %535 = vmatmul.bf16.vlgmr.msra.gmra.mxu1 %v4141_v46  ;;  %v3903_v36 = vld [vmem:[#allocation4 + $0x4d4] sm:$0xf]  ;;  %v3577_v16 = vld [vmem:[#allocation4 + $0x63c] sm:$0xf0]  ;;  %v3868_v24 = vld [vmem:[#allocation4 + $0x3bc] sm:$0xf] }
  0x94   :  { %549 = vmatmul.bf16.vlgmr.msra.gmra.mxu2 %v4139_v45  ;;  %563 = vmatmul.bf16.vlgmr.msra.gmra.mxu3 %v4141_v46 }
  0x95   :  { %2061 = vmatpush.bf16.msra.mxu0 %v2988_v47  ;;  %2075 = vmatpush.bf16.msra.mxu1 %v3212_v50  ;;  %v3043_v47 = vld [vmem:[#allocation4 + $0x1f8] sm:$0xf] }
  0x96   :  { %2089 = vmatpush.bf16.msra.mxu2 %v3436_v53  ;;  %2103 = vmatpush.bf16.msra.mxu3 %v3660_v55  ;;  %v3267_v50 = vld [vmem:[#allocation4 + $0x3b8] sm:$0xf]  ;;  %v2791_v53 = vld [vmem:[#allocation4] sm:$0xf]  ;;  %v3044_v54 = vor.u32 %v3815_v48, %v3043_v47  ;;  %v3966_v47 = vld [vmem:[#allocation4 + $0x6cc] sm:$0xf] }
  0x97   :  { %v3015_v55 = vld [vmem:[#allocation4 + $0x1c0] sm:$0xf]  ;;  %v3268_v57 = vor.u32 %v3871_v51, %v3267_v50  ;;  %v3756_v51 = vld [vmem:[#allocation4 + $0x3c] sm:$0xf] }
  0x99   :  { %2062 = vmatpush.bf16.msra.mxu0 %v2960_v59  ;;  %2076 = vmatpush.bf16.msra.mxu1 %v3184_v62  ;;  %v3854_v59 = vld [vmem:[#allocation4 + $0x34c] sm:$0xf]  ;;  %v3016_v62 = vor.u32 %v3808_v56, %v3015_v55  ;;  %v3819_v55 = vld [vmem:[#allocation4 + $0x234] sm:$0xf]  ;;  %v3073_v56 = vld [vmem:[#allocation4 + $0x24c] sm:$0xf0] }
  0x9a   :  { %2090 = vmatpush.bf16.msra.mxu2 %v3408_v2  ;;  %2104 = vmatpush.bf16.msra.mxu3 %v3632_v4  ;;  %v3216_v2 = vor.u32 %v3854_v59, %v3213_v60  ;;  %v3847_v4 = vld [vmem:[#allocation4 + $0x314] sm:$0xf]  ;;  %v3633_v59 = vld [vmem:[#allocation4 + $0x6ac] sm:$0xf0] }
  0x9b   :  { %v3188_v7 = vor.u32 %v3847_v4, %v3185_v5  ;;  %v3812_v4 = vld [vmem:[#allocation4 + $0x1fc] sm:$0xf]  ;;  %v3045_v5 = vld [vmem:[#allocation4 + $0x214] sm:$0xf0] }
  0x9d   :  { %2063 = vmatpush.bf16.msra.mxu0 %v2932_v8  ;;  %2077 = vmatpush.bf16.msra.mxu1 %v3156_v11  ;;  %v3784_v8 = vld [vmem:[#allocation4 + $0x11c] sm:$0xf]  ;;  %v3777_v11 = vld [vmem:[#allocation4 + $0xe4] sm:$0xf] }
  0x9e   :  { %2091 = vmatpush.bf16.msra.mxu2 %v3380_v14  ;;  %2105 = vmatpush.bf16.msra.mxu3 %v3604_v0  ;;  %v2936_v10 = vor.u32 %v3784_v8, %v2933_v9  ;;  %v2908_v13 = vor.u32 %v3777_v11, %v2905_v12  ;;  %v3519_v14 = vld [vmem:[#allocation4 + $0x5b0] sm:$0xf]  ;;  %v3605_v8 = vld [vmem:[#allocation4 + $0x674] sm:$0xf0]  ;;  %v3325_v11 = vld [vmem:[#allocation4 + $0x444] sm:$0xf0] }
  0x9f   :  { %v3520_v0 = vor.u32 %v3934_v15, %v3519_v14  ;;  %v3017_v14 = vld [vmem:[#allocation4 + $0x1dc] sm:$0xf0]  ;;  %v3945_v15 = vld [vmem:[#allocation4 + $0x624] sm:$0xf] }
  0xa0   :  { %v3580_v17 = vor.u32 %v3945_v15, %v3577_v16  ;;  %v3191_v16 = vld [vmem:[#allocation4 + $0x318] sm:$0xf] }
  0xa1   :  { %2064 = vmatpush.bf16.msra.mxu0 %v2904_v19  ;;  %2078 = vmatpush.bf16.msra.mxu1 %v3128_v22  ;;  %v3239_v19 = vld [vmem:[#allocation4 + $0x380] sm:$0xf]  ;;  %v3770_v22 = vld [vmem:[#allocation4 + $0xac] sm:$0xf] }
  0xa2   :  { %2092 = vmatpush.bf16.msra.mxu2 %v3352_v25  ;;  %2106 = vmatpush.bf16.msra.mxu3 %v3576_v27  ;;  %v3240_v21 = vor.u32 %v3864_v20, %v3239_v19  ;;  %v2880_v25 = vor.u32 %v3770_v22, %v2877_v23  ;;  %v3491_v27 = vld [vmem:[#allocation4 + $0x578] sm:$0xf]  ;;  %v3297_v19 = vld [vmem:[#allocation4 + $0x40c] sm:$0xf0]  ;;  %v3549_v22 = vld [vmem:[#allocation4 + $0x604] sm:$0xf0] }
  0xa3   :  { %577 = vmatmul.bf16.vlgmr.msrb.gmra.mxu0 %v4139_v45  ;;  %591 = vmatmul.bf16.vlgmr.msrb.gmra.mxu1 %v4141_v46  ;;  %v3492_v30 = vor.u32 %v3927_v28, %v3491_v27  ;;  %v3931_v27 = vld [vmem:[#allocation4 + $0x5b4] sm:$0xf]  ;;  %v3521_v28 = vld [vmem:[#allocation4 + $0x5cc] sm:$0xf0] }
  0xa4   :  { %605 = vmatmul.bf16.vlgmr.msrb.gmra.mxu2 %v4139_v45  ;;  %619 = vmatmul.bf16.vlgmr.msrb.gmra.mxu3 %v4141_v46  ;;  %v3752_v45 = vld [vmem:[#allocation4 + $0x18] sm:$0xf0]  ;;  %v3798_v46 = vld [vmem:[#allocation4 + $0x18c] sm:$0xf] }
  0xa5   :  { %2065 = vmatpush.bf16.msra.mxu0 %v2876_v31  ;;  %2079 = vmatpush.bf16.msra.mxu1 %v3100_v33  ;;  %v2792_v61 = vor.u32 %v3752_v45, %v2791_v53  ;;  %v2992_v63 = vor.u32 %v3798_v46, %v2989_v58  ;;  %v3833_v31 = vld [vmem:[#allocation4 + $0x2a4] sm:$0xf]  ;;  %v3896_v53 = vld [vmem:[#allocation4 + $0x49c] sm:$0xf]  ;;  %v3076_v58 = vor.u32 %v3819_v55, %v3073_v56 }
  0xa6   :  { %2093 = vmatpush.bf16.msra.mxu2 %v3324_v37  ;;  %2107 = vmatpush.bf16.msra.mxu3 %v3548_v38  ;;  %v3132_v33 = vor.u32 %v3833_v31, %v3129_v32  ;;  %v2852_v37 = vor.u32 %v3763_v34, %v2849_v35  ;;  %v3409_v38 = vld [vmem:[#allocation4 + $0x4ec] sm:$0xf0]  ;;  %v3861_v31 = vld [vmem:[#allocation4 + $0x384] sm:$0xf]  ;;  %v3241_v32 = vld [vmem:[#allocation4 + $0x39c] sm:$0xf0] }
  0xa7   :  { %v3244_v35 = vor.u32 %v3861_v31, %v3241_v32  ;;  %v3844_v31 = vld [vmem:[#allocation4 + $0x2f8] sm:$0xf0] }
  0xa9   :  { %2066 = vmatpush.bf16.msra.mxu0 %v2848_v41  ;;  %2080 = vmatpush.bf16.msra.mxu1 %v3072_v43  ;;  %v3412_v41 = vor.u32 %v3903_v36, %v3409_v38  ;;  %v3826_v43 = vld [vmem:[#allocation4 + $0x26c] sm:$0xf]  ;;  %v3493_v38 = vld [vmem:[#allocation4 + $0x594] sm:$0xf0] }
  0xaa   :  { %2094 = vmatpush.bf16.msra.mxu2 %v3296_v49  ;;  %2108 = vmatpush.bf16.msra.mxu3 %v3520_v0  ;;  %v3104_v48 = vor.u32 %v3826_v43, %v3101_v44  ;;  %v3661_v49 = vld [vmem:[#allocation4 + $0x6e4] sm:$0xf0] }
  0xab   :  { %v3664_v50 = vor.u32 %v3966_v47, %v3661_v49 }
  0xad   :  { %2067 = vmatpush.bf16.msra.mxu0 %v2820_v52  ;;  %2081 = vmatpush.bf16.msra.mxu1 %v3044_v54  ;;  %v2821_v52 = vld [vmem:[#allocation4 + $0x54] sm:$0xf0] }
  0xae   :  { %2095 = vmatpush.bf16.msra.mxu2 %v3268_v57  ;;  %2109 = vmatpush.bf16.msra.mxu3 %v3492_v30  ;;  %v2824_v45 = vor.u32 %v3756_v51, %v2821_v52  ;;  %v3381_v54 = vld [vmem:[#allocation4 + $0x4b4] sm:$0xf0]  ;;  %v3959_v57 = vld [vmem:[#allocation4 + $0x694] sm:$0xf]  ;;  %v3524_v30 = vor.u32 %v3931_v27, %v3521_v28 }
  0xaf   :  { %v3384_v46 = vor.u32 %v3896_v53, %v3381_v54  ;;  %v3636_v60 = vor.u32 %v3959_v57, %v3633_v59  ;;  %v3802_v54 = vld [vmem:[#allocation4 + $0x1a8] sm:$0xf0] }
  0xb1   :  { %2068 = vmatpush.bf16.msra.mxu0 %v2792_v61  ;;  %2082 = vmatpush.bf16.msra.mxu1 %v3016_v62  ;;  %v3749_v61 = vld [vmem:[#allocation4 + $0x4] sm:$0xf]  ;;  %v2793_v62 = vld [vmem:[#allocation4 + $0x1c] sm:$0xf0] }
  0xb2   :  { %2096 = vmatpush.bf16.msra.mxu2 %v3240_v21  ;;  %2110 = vmatpush.bf16.msra.mxu3 %v3464_v42  ;;  %v2796_v1 = vor.u32 %v3749_v61, %v2793_v62  ;;  %v3938_v21 = vld [vmem:[#allocation4 + $0x5ec] sm:$0xf]  ;;  %v3465_v42 = vld [vmem:[#allocation4 + $0x55c] sm:$0xf0]  ;;  %v2967_v61 = vld [vmem:[#allocation4 + $0x158] sm:$0xf] }
  0xb3   :  { %v3552_v23 = vor.u32 %v3938_v21, %v3549_v22  ;;  %v3795_v62 = vld [vmem:[#allocation4 + $0x170] sm:$0xf0]  ;;  %v3781_v21 = vld [vmem:[#allocation4 + $0x100] sm:$0xf0] }
  0xb5   :  { %2117 = vmatpush.bf16.msrb.mxu0 %v2992_v63  ;;  %2131 = vmatpush.bf16.msrb.mxu1 %v3216_v2  ;;  %v3889_v63 = vld [vmem:[#allocation4 + $0x464] sm:$0xf]  ;;  %v3353_v2 = vld [vmem:[#allocation4 + $0x47c] sm:$0xf0] }
  0xb6   :  { %2145 = vmatpush.bf16.msrb.mxu2 %v3440_v29  ;;  %2159 = vmatpush.bf16.msrb.mxu3 %v3664_v50  ;;  %v3356_v3 = vor.u32 %v3889_v63, %v3353_v2  ;;  %v4154_v29 = vld [vmem:[%s4239_s4] sm:$0xf] }
  0xb7   :  { %v185_v36 = vperm.slane %v4154_v29, 0  ;;  %v188_v22 = vperm.slane %v4154_v29, 3 }
  0xb9   :  { %2118 = vmatpush.bf16.msrb.mxu0 %v2964_v6  ;;  %2132 = vmatpush.bf16.msrb.mxu1 %v3188_v7  ;;  %v3048_v6 = vor.u32 %v3812_v4, %v3045_v5  ;;  %v3952_v7 = vld [vmem:[#allocation4 + $0x65c] sm:$0xf]  ;;  %v187_v4 = vperm.slane %v4154_v29, 2 }
  0xba   :  { %2146 = vmatpush.bf16.msrb.mxu2 %v3412_v41  ;;  %2160 = vmatpush.bf16.msrb.mxu3 %v3636_v60  ;;  %v3608_v9 = vor.u32 %v3952_v7, %v3605_v8  ;;  %v3917_v41 = vld [vmem:[#allocation4 + $0x544] sm:$0xf]  ;;  %v3219_v7 = vld [vmem:[#allocation4 + $0x350] sm:$0xf]  ;;  %v3858_v8 = vld [vmem:[#allocation4 + $0x368] sm:$0xf0] }
  0xbb   :  { %v3468_v47 = vor.u32 %v3917_v41, %v3465_v42  ;;  %v3135_v41 = vld [vmem:[#allocation4 + $0x2a8] sm:$0xf]  ;;  %v3837_v42 = vld [vmem:[#allocation4 + $0x2c0] sm:$0xf0] }
  0xbd   :  { %2119 = vmatpush.bf16.msrb.mxu0 %v2936_v10  ;;  %2133 = vmatpush.bf16.msrb.mxu1 %v3160_v18  ;;  %v3882_v10 = vld [vmem:[#allocation4 + $0x42c] sm:$0xf]  ;;  %v3875_v18 = vld [vmem:[#allocation4 + $0x3f4] sm:$0xf] }
  0xbe   :  { %2147 = vmatpush.bf16.msrb.mxu2 %v3384_v46  ;;  %v3328_v12 = vor.u32 %v3882_v10, %v3325_v11  ;;  %2161 = vmatpush.bf16.msrb.mxu3 %v3608_v9  ;;  %v3300_v20 = vor.u32 %v3875_v18, %v3297_v19  ;;  %v2939_v9 = vld [vmem:[#allocation4 + $0x120] sm:$0xf]  ;;  %v3788_v10 = vld [vmem:[#allocation4 + $0x138] sm:$0xf0] }
  0xc1   :  { %2120 = vmatpush.bf16.msrb.mxu0 %v2908_v13  ;;  %2134 = vmatpush.bf16.msrb.mxu1 %v3132_v33  ;;  %v3805_v13 = vld [vmem:[#allocation4 + $0x1c4] sm:$0xf] }
  0xc2   :  { %2148 = vmatpush.bf16.msrb.mxu2 %v3356_v3  ;;  %v3020_v0 = vor.u32 %v3805_v13, %v3017_v14  ;;  %2162 = vmatpush.bf16.msrb.mxu3 %v3580_v17  ;;  %v3220_v14 = vor.u32 %v3858_v8, %v3219_v7  ;;  %v3851_v17 = vld [vmem:[#allocation4 + $0x330] sm:$0xf0]  ;;  %v3079_v7 = vld [vmem:[#allocation4 + $0x238] sm:$0xf] }
  0xc5   :  { %2121 = vmatpush.bf16.msrb.mxu0 %v2880_v25  ;;  %2135 = vmatpush.bf16.msrb.mxu1 %v3104_v48  ;;  %v3269_v25 = vld [vmem:[#allocation4 + $0x3d4] sm:$0xf0]  ;;  %v186_v48 = vperm.slane %v4154_v29, 1 }
  0xc6   :  { %2149 = vmatpush.bf16.msrb.mxu2 %v3328_v12  ;;  %2163 = vmatpush.bf16.msrb.mxu3 %v3552_v23  ;;  %v3272_v26 = vor.u32 %v3868_v24, %v3269_v25 }
  0xc9   :  { %2122 = vmatpush.bf16.msrb.mxu0 %v2852_v37  ;;  %2136 = vmatpush.bf16.msrb.mxu1 %v3076_v58  ;;  %v3924_v37 = vld [vmem:[#allocation4 + $0x57c] sm:$0xf] }
  0xca   :  { %2150 = vmatpush.bf16.msrb.mxu2 %v3300_v20  ;;  %2164 = vmatpush.bf16.msrb.mxu3 %v3524_v30  ;;  %v3496_v39 = vor.u32 %v3924_v37, %v3493_v38  ;;  %v2911_v20 = vld [vmem:[#allocation4 + $0xe8] sm:$0xf]  ;;  %v3163_v30 = vld [vmem:[#allocation4 + $0x2e0] sm:$0xf]  ;;  %v3774_v37 = vld [vmem:[#allocation4 + $0xc8] sm:$0xf0] }
  0xcb   :  { %v2912_v28 = vor.u32 %v3781_v21, %v2911_v20  ;;  %v3799_v20 = vld [vmem:[#allocation4 + $0x194] sm:$0xf]  ;;  %v2997_v21 = vld [vmem:[#allocation4 + $0x1ac] sm:$0xf0] }
  0xcd   :  { %2123 = vmatpush.bf16.msrb.mxu0 %v2824_v45  ;;  %2137 = vmatpush.bf16.msrb.mxu1 %v3048_v6  ;;  %v2995_v45 = vld [vmem:[#allocation4 + $0x190] sm:$0xf]  ;;  %v2968_v6 = vor.u32 %v3795_v62, %v2967_v61  ;;  %v3387_v62 = vld [vmem:[#allocation4 + $0x4a0] sm:$0xf] }
  0xce   :  { %2151 = vmatpush.bf16.msrb.mxu2 %v3272_v26  ;;  %2165 = vmatpush.bf16.msrb.mxu3 %v3496_v39  ;;  %v2996_v57 = vor.u32 %v3802_v54, %v2995_v45  ;;  %v3192_v26 = vor.u32 %v3851_v17, %v3191_v16  ;;  %v3164_v39 = vor.u32 %v3844_v31, %v3163_v30  ;;  %v2799_v16 = vld [vmem:[#allocation4 + $0x8] sm:$0xf]  ;;  %v3753_v17 = vld [vmem:[#allocation4 + $0x20] sm:$0xf0]  ;;  %v3331_v30 = vld [vmem:[#allocation4 + $0x430] sm:$0xf] }
  0xcf   :  { %v3136_v54 = vor.u32 %v3837_v42, %v3135_v41  ;;  %v3886_v31 = vld [vmem:[#allocation4 + $0x448] sm:$0xf0]  ;;  %v3221_v41 = vld [vmem:[#allocation4 + $0x36c] sm:$0xf0] }
  0xd1   :  { %2124 = vmatpush.bf16.msrb.mxu0 %v2796_v1  ;;  %2138 = vmatpush.bf16.msrb.mxu1 %v3020_v0  ;;  %v2940_v0 = vor.u32 %v3788_v10, %v2939_v9  ;;  %v3823_v10 = vld [vmem:[#allocation4 + $0x250] sm:$0xf0] }
  0xd2   :  { %2152 = vmatpush.bf16.msrb.mxu2 %v3244_v35  ;;  %2166 = vmatpush.bf16.msrb.mxu3 %v3468_v47 }
 0x110   :  { %v522_v33 = vpop.f32.mrf.mxu0  ;;  %v536_v34 = vpop.f32.mrf.mxu1 }
 0x111   :  { %v523_v40 = vadd.f32 %v522_v33, %v185_v36  ;;  %v3443_v33 = vld [vmem:[#allocation4 + $0x510] sm:$0xf] }
 0x113   :  { %v537_v51 = vadd.f32 %v536_v34, %v523_v40  ;;  %v3914_v34 = vld [vmem:[#allocation4 + $0x528] sm:$0xf0] }
 0x114   :  { %v3444_v40 = vor.u32 %v3914_v34, %v3443_v33  ;;  %v3792_v34 = vld [vmem:[#allocation4 + $0x15c] sm:$0xf] }
 0x115   :  { %v625_v55 = vmax.f32 %v537_v51, 0.0 }
 0x117   :  { %v550_v43 = vpop.f32.mrf.mxu2  ;;  %v564_v44 = vpop.f32.mrf.mxu3 }
 0x118   :  { %v524_v49 = vpop.f32.mrf.mxu0  ;;  %v538_v50 = vpop.f32.mrf.mxu1  ;;  %v551_v46 = vadd.f32 %v550_v43, %v186_v48 }
 0x119   :  { %v525_v52 = vadd.f32 %v524_v49, %v185_v36  ;;  %v2883_v36 = vld [vmem:[#allocation4 + $0xb0] sm:$0xf]  ;;  %v3907_v49 = vld [vmem:[#allocation4 + $0x4f0] sm:$0xf0] }
 0x11a   :  { %v565_v63 = vadd.f32 %v564_v44, %v551_v46  ;;  %v2884_v47 = vor.u32 %v3774_v37, %v2883_v36  ;;  %v3107_v46 = vld [vmem:[#allocation4 + $0x270] sm:$0xf]  ;;  %v3023_v36 = vld [vmem:[#allocation4 + $0x1c8] sm:$0xf]  ;;  %v3809_v37 = vld [vmem:[#allocation4 + $0x1e0] sm:$0xf0] }
 0x11b   :  { %v539_v53 = vadd.f32 %v538_v50, %v525_v52  ;;  %v2855_v52 = vld [vmem:[#allocation4 + $0x78] sm:$0xf] }
 0x11c   :  { %v626_v11 = vmax.f32 %v565_v63, 0.0  ;;  %v3900_v63 = vld [vmem:[#allocation4 + $0x4b8] sm:$0xf0] }
 0x11d   :  { %v629_v56 = vmax.f32 %v539_v53, 0.0  ;;  %v3767_v53 = vld [vmem:[#allocation4 + $0x90] sm:$0xf0]  ;;  %v3388_v9 = vor.u32 %v3900_v63, %v3387_v62  ;;  %v2913_v62 = vld [vmem:[#allocation4 + $0x104] sm:$0xf0] }
 0x11e   :  { %v2856_v61 = vor.u32 %v3767_v53, %v2855_v52  ;;  %v3555_v53 = vld [vmem:[#allocation4 + $0x5f0] sm:$0xf] }
 0x11f   :  { %v4158_v58 = vpack.c.bf16 %v629_v56, %v625_v55  ;;  %v552_v59 = vpop.f32.mrf.mxu2  ;;  %v566_v60 = vpop.f32.mrf.mxu3 }
 0x120   :  { %v553_v1 = vadd.f32 %v552_v59, %v186_v48  ;;  %v578_v2 = vpop.f32.mrf.mxu0  ;;  %v592_v3 = vpop.f32.mrf.mxu1  ;;  %v3415_v48 = vld [vmem:[#allocation4 + $0x4d8] sm:$0xf]  ;;  %v3667_v59 = vld [vmem:[#allocation4 + $0x6d0] sm:$0xf] }
 0x121   :  { %2069 = vmatmul.bf16.vlgmr.msra.gmra.mxu0 %v4158_v58  ;;  %v579_v13 = vadd.f32 %v578_v2, %v187_v4  ;;  %v3416_v56 = vor.u32 %v3907_v49, %v3415_v48  ;;  %v3024_v48 = vor.u32 %v3809_v37, %v3023_v36 }
 0x122   :  { %v567_v5 = vadd.f32 %v566_v60, %v553_v1  ;;  %2173 = vmatpush.bf16.msra.mxu0 %v2996_v57  ;;  %v3830_v57 = vld [vmem:[#allocation4 + $0x288] sm:$0xf0] }
 0x123   :  { %v593_v24 = vadd.f32 %v592_v3, %v579_v13  ;;  %v3970_v60 = vld [vmem:[#allocation4 + $0x6e8] sm:$0xf0]  ;;  %v2827_v3 = vld [vmem:[#allocation4 + $0x40] sm:$0xf] }
 0x124   :  { %v630_v12 = vmax.f32 %v567_v5, 0.0  ;;  %v3108_v5 = vor.u32 %v3830_v57, %v3107_v46  ;;  %v3848_v46 = vld [vmem:[#allocation4 + $0x31c] sm:$0xf]  ;;  %v3275_v57 = vld [vmem:[#allocation4 + $0x3c0] sm:$0xf] }
 0x125   :  { %v627_v38 = vmax.f32 %v593_v24, 0.0  ;;  %v3816_v24 = vld [vmem:[#allocation4 + $0x218] sm:$0xf0] }
 0x126   :  { %v4162_v15 = vpack.c.bf16 %v630_v12, %v626_v11  ;;  %2174 = vmatpush.bf16.msra.mxu0 %v2968_v6  ;;  %v3668_v6 = vor.u32 %v3970_v60, %v3667_v59  ;;  %v3639_v11 = vld [vmem:[#allocation4 + $0x698] sm:$0xf]  ;;  %v3963_v12 = vld [vmem:[#allocation4 + $0x6b0] sm:$0xf0]  ;;  %v3872_v59 = vld [vmem:[#allocation4 + $0x3d8] sm:$0xf0] }
 0x127   :  { %v606_v18 = vpop.f32.mrf.mxu2  ;;  %v620_v19 = vpop.f32.mrf.mxu3 }
 0x128   :  { %2083 = vmatmul.bf16.vlgmr.msra.gmra.mxu1 %v4162_v15  ;;  %v580_v23 = vpop.f32.mrf.mxu0  ;;  %v594_v27 = vpop.f32.mrf.mxu1  ;;  %v607_v35 = vadd.f32 %v606_v18, %v188_v22  ;;  %v3080_v18 = vor.u32 %v3823_v10, %v3079_v7  ;;  %v3247_v7 = vld [vmem:[#allocation4 + $0x388] sm:$0xf]  ;;  %v3771_v10 = vld [vmem:[#allocation4 + $0xb4] sm:$0xf] }
 0x129   :  { %2187 = vmatpush.bf16.msra.mxu1 %v3220_v14  ;;  %v581_v25 = vadd.f32 %v580_v23, %v187_v4  ;;  %v3760_v4 = vld [vmem:[#allocation4 + $0x58] sm:$0xf0]  ;;  %v3359_v14 = vld [vmem:[#allocation4 + $0x468] sm:$0xf] }
 0x12a   :  { %2175 = vmatpush.bf16.msra.mxu0 %v2940_v0  ;;  %v621_v50 = vadd.f32 %v620_v19, %v607_v35  ;;  %v2828_v13 = vor.u32 %v3760_v4, %v2827_v3  ;;  %v3893_v0 = vld [vmem:[#allocation4 + $0x480] sm:$0xf0]  ;;  %v3640_v19 = vor.u32 %v3963_v12, %v3639_v11  ;;  %v2969_v35 = vld [vmem:[#allocation4 + $0x174] sm:$0xf0]  ;;  %v3276_v3 = vor.u32 %v3872_v59, %v3275_v57  ;;  %v2885_v12 = vld [vmem:[#allocation4 + $0xcc] sm:$0xf0] }
 0x12b   :  { %v595_v32 = vadd.f32 %v594_v27, %v581_v25  ;;  %v3360_v23 = vor.u32 %v3893_v0, %v3359_v14  ;;  %v3611_v25 = vld [vmem:[#allocation4 + $0x660] sm:$0xf]  ;;  %v2800_v27 = vor.u32 %v3753_v17, %v2799_v16  ;;  %v2972_v42 = vor.u32 %v3792_v34, %v2969_v35  ;;  %v3841_v4 = vld [vmem:[#allocation4 + $0x2e4] sm:$0xf]  ;;  %v3445_v14 = vld [vmem:[#allocation4 + $0x52c] sm:$0xf0] }
 0x12c   :  { %v628_v1 = vmax.f32 %v621_v50, 0.0  ;;  %v3785_v50 = vld [vmem:[#allocation4 + $0x124] sm:$0xf]  ;;  %v3499_v16 = vld [vmem:[#allocation4 + $0x580] sm:$0xf] }
 0x12d   :  { %v631_v29 = vmax.f32 %v595_v32, 0.0  ;;  %2188 = vmatpush.bf16.msra.mxu1 %v3192_v26  ;;  %v3956_v26 = vld [vmem:[#allocation4 + $0x678] sm:$0xf0]  ;;  %v3967_v34 = vld [vmem:[#allocation4 + $0x6d4] sm:$0xf] }
 0x12e   :  { %2176 = vmatpush.bf16.msra.mxu0 %v2912_v28  ;;  %v3000_v28 = vor.u32 %v3799_v20, %v2997_v21  ;;  %v3612_v33 = vor.u32 %v3956_v26, %v3611_v25  ;;  %v3928_v17 = vld [vmem:[#allocation4 + $0x598] sm:$0xf0]  ;;  %v3137_v20 = vld [vmem:[#allocation4 + $0x2c4] sm:$0xf0]  ;;  %v2888_v21 = vor.u32 %v3771_v10, %v2885_v12  ;;  %v2857_v25 = vld [vmem:[#allocation4 + $0x94] sm:$0xf0] }
 0x12f   :  { %v4166_v43 = vpack.c.bf16 %v631_v29, %v627_v38  ;;  %v608_v44 = vpop.f32.mrf.mxu2  ;;  %v622_v45 = vpop.f32.mrf.mxu3  ;;  %v3583_v38 = vld [vmem:[#allocation4 + $0x628] sm:$0xf]  ;;  %v3949_v29 = vld [vmem:[#allocation4 + $0x640] sm:$0xf0]  ;;  %v3904_v26 = vld [vmem:[#allocation4 + $0x4dc] sm:$0xf] }
 0x130   :  { %v609_v51 = vadd.f32 %v608_v44, %v188_v22  ;;  %v3051_v22 = vld [vmem:[#allocation4 + $0x200] sm:$0xf]  ;;  %v3303_v44 = vld [vmem:[#allocation4 + $0x3f8] sm:$0xf]  ;;  %v3584_v49 = vor.u32 %v3949_v29, %v3583_v38  ;;  %v3669_v35 = vld [vmem:[#allocation4 + $0x6ec] sm:$0xf0] }
 0x131   :  { %2189 = vmatpush.bf16.msra.mxu1 %v3164_v39  ;;  %2097 = vmatmul.bf16.vlgmr.msra.gmra.mxu2 %v4166_v43  ;;  %v3052_v32 = vor.u32 %v3816_v24, %v3051_v22  ;;  %v3332_v39 = vor.u32 %v3886_v31, %v3331_v30  ;;  %v3500_v24 = vor.u32 %v3928_v17, %v3499_v16  ;;  %v3471_v30 = vld [vmem:[#allocation4 + $0x548] sm:$0xf]  ;;  %v3921_v31 = vld [vmem:[#allocation4 + $0x560] sm:$0xf0]  ;;  %v3003_v57 = vld [vmem:[#allocation4 + $0x198] sm:$0xf] }
 0x132   :  { %v623_v55 = vadd.f32 %v622_v45, %v609_v51  ;;  %2125 = vmatmul.bf16.vlgmr.msrb.gmra.mxu0 %v4158_v58  ;;  %2201 = vmatpush.bf16.msra.mxu2 %v3444_v40  ;;  %v3855_v40 = vld [vmem:[#allocation4 + $0x354] sm:$0xf]  ;;  %v2941_v51 = vld [vmem:[#allocation4 + $0x13c] sm:$0xf0]  ;;  %v3942_v45 = vld [vmem:[#allocation4 + $0x608] sm:$0xf0]  ;;  %v3472_v29 = vor.u32 %v3921_v31, %v3471_v30 }
 0x133   :  { %2177 = vmatpush.bf16.msra.mxu0 %v2884_v47  ;;  %v3879_v47 = vld [vmem:[#allocation4 + $0x410] sm:$0xf0]  ;;  %v3224_v52 = vor.u32 %v3855_v40, %v3221_v41  ;;  %v3556_v60 = vor.u32 %v3942_v45, %v3555_v53  ;;  %v3757_v38 = vld [vmem:[#allocation4 + $0x44] sm:$0xf]  ;;  %v3389_v41 = vld [vmem:[#allocation4 + $0x4bc] sm:$0xf0] }
 0x134   :  { %v632_v2 = vmax.f32 %v623_v55, 0.0  ;;  %v3193_v55 = vld [vmem:[#allocation4 + $0x334] sm:$0xf0]  ;;  %v3897_v40 = vld [vmem:[#allocation4 + $0x4a4] sm:$0xf] }
 0x135   :  { %2190 = vmatpush.bf16.msra.mxu1 %v3136_v54  ;;  %v3304_v54 = vor.u32 %v3879_v47, %v3303_v44  ;;  %v3196_v63 = vor.u32 %v3848_v46, %v3193_v55  ;;  %v3672_v44 = vor.u32 %v3967_v34, %v3669_v35  ;;  %v3820_v47 = vld [vmem:[#allocation4 + $0x23c] sm:$0xf]  ;;  %v3750_v53 = vld [vmem:[#allocation4 + $0xc] sm:$0xf]  ;;  %v2801_v45 = vld [vmem:[#allocation4 + $0x24] sm:$0xf0] }
 0x136   :  { %v4170_v8 = vpack.c.bf16 %v632_v2, %v628_v1  ;;  %2202 = vmatpush.bf16.msra.mxu2 %v3416_v56  ;;  %v2944_v56 = vor.u32 %v3785_v50, %v2941_v51  ;;  %v3527_v1 = vld [vmem:[#allocation4 + $0x5b8] sm:$0xf]  ;;  %v3935_v2 = vld [vmem:[#allocation4 + $0x5d0] sm:$0xf0]  ;;  %v3361_v46 = vld [vmem:[#allocation4 + $0x484] sm:$0xf0] }
 0x137   :  { %2178 = vmatpush.bf16.msra.mxu0 %v2856_v61  ;;  %v3778_v61 = vld [vmem:[#allocation4 + $0xec] sm:$0xf]  ;;  %v3528_v11 = vor.u32 %v3935_v2, %v3527_v1  ;;  %v3641_v50 = vld [vmem:[#allocation4 + $0x6b4] sm:$0xf0]  ;;  %v3803_v59 = vld [vmem:[#allocation4 + $0x1b0] sm:$0xf0]  ;;  %v2804_v1 = vor.u32 %v3750_v53, %v2801_v45 }
 0x138   :  { %2111 = vmatmul.bf16.vlgmr.msra.gmra.mxu3 %v4170_v8  ;;  %2139 = vmatmul.bf16.vlgmr.msrb.gmra.mxu1 %v4162_v15  ;;  %v3796_v10 = vld [vmem:[#allocation4 + $0x178] sm:$0xf0]  ;;  %v3025_v12 = vld [vmem:[#allocation4 + $0x1e4] sm:$0xf0]  ;;  %v3227_v16 = vld [vmem:[#allocation4 + $0x358] sm:$0xf] }
 0x139   :  { %2191 = vmatpush.bf16.msra.mxu1 %v3108_v5  ;;  %2215 = vmatpush.bf16.msra.mxu3 %v3668_v6  ;;  %v3165_v5 = vld [vmem:[#allocation4 + $0x2fc] sm:$0xf0]  ;;  %v2916_v6 = vor.u32 %v3778_v61, %v2913_v62  ;;  %v3953_v62 = vld [vmem:[#allocation4 + $0x664] sm:$0xf]  ;;  %v3859_v17 = vld [vmem:[#allocation4 + $0x370] sm:$0xf0] }
 0x13a   :  { %2203 = vmatpush.bf16.msra.mxu2 %v3388_v9  ;;  %v3865_v9 = vld [vmem:[#allocation4 + $0x3a0] sm:$0xf0]  ;;  %v3168_v0 = vor.u32 %v3841_v4, %v3165_v5  ;;  %v3053_v61 = vld [vmem:[#allocation4 + $0x21c] sm:$0xf0]  ;;  %v3883_v4 = vld [vmem:[#allocation4 + $0x434] sm:$0xf] }
 0x13b   :  { %2179 = vmatpush.bf16.msra.mxu0 %v2828_v13  ;;  %v3911_v13 = vld [vmem:[#allocation4 + $0x514] sm:$0xf]  ;;  %v3333_v5 = vld [vmem:[#allocation4 + $0x44c] sm:$0xf0]  ;;  %v3199_v30 = vld [vmem:[#allocation4 + $0x320] sm:$0xf] }
 0x13c   :  { %v3448_v22 = vor.u32 %v3911_v13, %v3445_v14  ;;  %v3946_v13 = vld [vmem:[#allocation4 + $0x62c] sm:$0xf]  ;;  %v3585_v14 = vld [vmem:[#allocation4 + $0x644] sm:$0xf0]  ;;  %v3852_v31 = vld [vmem:[#allocation4 + $0x338] sm:$0xf0] }
 0x13d   :  { %2192 = vmatpush.bf16.msra.mxu1 %v3080_v18  ;;  %2216 = vmatpush.bf16.msra.mxu3 %v3640_v19  ;;  %v3248_v18 = vor.u32 %v3865_v9, %v3247_v7  ;;  %v3834_v19 = vld [vmem:[#allocation4 + $0x2ac] sm:$0xf]  ;;  %v2975_v9 = vld [vmem:[#allocation4 + $0x160] sm:$0xf]  ;;  %v3915_v53 = vld [vmem:[#allocation4 + $0x530] sm:$0xf0] }
 0x13e   :  { %2204 = vmatpush.bf16.msra.mxu2 %v3360_v23  ;;  %v3764_v23 = vld [vmem:[#allocation4 + $0x7c] sm:$0xf]  ;;  %v3277_v34 = vld [vmem:[#allocation4 + $0x3dc] sm:$0xf0] }
 0x13f   :  { %2180 = vmatpush.bf16.msra.mxu0 %v2800_v27  ;;  %v3417_v27 = vld [vmem:[#allocation4 + $0x4f4] sm:$0xf0]  ;;  %v2860_v36 = vor.u32 %v3764_v23, %v2857_v25  ;;  %v2947_v23 = vld [vmem:[#allocation4 + $0x128] sm:$0xf]  ;;  %v3228_v25 = vor.u32 %v3859_v17, %v3227_v16 }
 0x140   :  { %v3420_v37 = vor.u32 %v3904_v26, %v3417_v27  ;;  %v3939_v26 = vld [vmem:[#allocation4 + $0x5f4] sm:$0xf]  ;;  %v3557_v27 = vld [vmem:[#allocation4 + $0x60c] sm:$0xf0] }
 0x141   :  { %2193 = vmatpush.bf16.msra.mxu1 %v3052_v32  ;;  %2217 = vmatpush.bf16.msra.mxu3 %v3612_v33  ;;  %v3827_v32 = vld [vmem:[#allocation4 + $0x274] sm:$0xf]  ;;  %v3109_v33 = vld [vmem:[#allocation4 + $0x28c] sm:$0xf0]  ;;  %v3560_v35 = vor.u32 %v3939_v26, %v3557_v27  ;;  %v3754_v27 = vld [vmem:[#allocation4 + $0x28] sm:$0xf0] }
 0x142   :  { %2153 = vmatmul.bf16.vlgmr.msrb.gmra.mxu2 %v4166_v43  ;;  %2181 = vmatmul.bf16.vlgmr.msra.gmra.mxu0 %v4158_v58 }
 0x143   :  { %2229 = vmatpush.bf16.msrb.mxu0 %v3000_v28  ;;  %2205 = vmatpush.bf16.msra.mxu2 %v3332_v39  ;;  %v3140_v28 = vor.u32 %v3834_v19, %v3137_v20  ;;  %v2829_v39 = vld [vmem:[#allocation4 + $0x5c] sm:$0xf0]  ;;  %v3876_v19 = vld [vmem:[#allocation4 + $0x3fc] sm:$0xf]  ;;  %v3305_v20 = vld [vmem:[#allocation4 + $0x414] sm:$0xf0] }
 0x144   :  { %v2832_v51 = vor.u32 %v3757_v38, %v2829_v39  ;;  %v3200_v38 = vor.u32 %v3852_v31, %v3199_v30  ;;  %v3529_v39 = vld [vmem:[#allocation4 + $0x5d4] sm:$0xf0]  ;;  %v3894_v30 = vld [vmem:[#allocation4 + $0x488] sm:$0xf0] }
 0x145   :  { %2194 = vmatpush.bf16.msra.mxu1 %v3024_v48  ;;  %2218 = vmatpush.bf16.msra.mxu3 %v3584_v49  ;;  %v3081_v48 = vld [vmem:[#allocation4 + $0x254] sm:$0xf0]  ;;  %v3960_v49 = vld [vmem:[#allocation4 + $0x69c] sm:$0xf] }
 0x146   :  { %v3084_v55 = vor.u32 %v3820_v47, %v3081_v48  ;;  %v3862_v47 = vld [vmem:[#allocation4 + $0x38c] sm:$0xf]  ;;  %v3249_v48 = vld [vmem:[#allocation4 + $0x3a4] sm:$0xf0] }
 0x147   :  { %2230 = vmatpush.bf16.msrb.mxu0 %v2972_v42  ;;  %2206 = vmatpush.bf16.msra.mxu2 %v3304_v54  ;;  %v3112_v42 = vor.u32 %v3827_v32, %v3109_v33  ;;  %v3890_v54 = vld [vmem:[#allocation4 + $0x46c] sm:$0xf]  ;;  %v3869_v33 = vld [vmem:[#allocation4 + $0x3c4] sm:$0xf] }
 0x148   :  { %2167 = vmatmul.bf16.vlgmr.msrb.gmra.mxu3 %v4170_v8  ;;  %2195 = vmatmul.bf16.vlgmr.msra.gmra.mxu1 %v4162_v15  ;;  %v3364_v2 = vor.u32 %v3890_v54, %v3361_v46  ;;  %v3925_v54 = vld [vmem:[#allocation4 + $0x584] sm:$0xf]  ;;  %v3501_v46 = vld [vmem:[#allocation4 + $0x59c] sm:$0xf0] }
 0x149   :  { %2243 = vmatpush.bf16.msrb.mxu1 %v3224_v52  ;;  %2219 = vmatpush.bf16.msra.mxu3 %v3556_v60  ;;  %v3392_v52 = vor.u32 %v3897_v40, %v3389_v41  ;;  %v3813_v60 = vld [vmem:[#allocation4 + $0x204] sm:$0xf]  ;;  %v3280_v40 = vor.u32 %v3869_v33, %v3277_v34  ;;  %v3171_v41 = vld [vmem:[#allocation4 + $0x2e8] sm:$0xf]  ;;  %v3800_v33 = vld [vmem:[#allocation4 + $0x19c] sm:$0xf] }
 0x14a   :  { %v3005_v34 = vld [vmem:[#allocation4 + $0x1b4] sm:$0xf0] }
 0x14b   :  { %2231 = vmatpush.bf16.msrb.mxu0 %v2944_v56  ;;  %2207 = vmatpush.bf16.msra.mxu2 %v3276_v3  ;;  %v3644_v56 = vor.u32 %v3960_v49, %v3641_v50  ;;  %v3004_v3 = vor.u32 %v3803_v59, %v3003_v57  ;;  %v2891_v49 = vld [vmem:[#allocation4 + $0xb8] sm:$0xf]  ;;  %v3838_v57 = vld [vmem:[#allocation4 + $0x2c8] sm:$0xf0] }
 0x14d   :  { %2244 = vmatpush.bf16.msrb.mxu1 %v3196_v63  ;;  %2220 = vmatpush.bf16.msra.mxu3 %v3528_v11  ;;  %v3613_v63 = vld [vmem:[#allocation4 + $0x67c] sm:$0xf0]  ;;  %v3806_v11 = vld [vmem:[#allocation4 + $0x1cc] sm:$0xf] }
 0x14e   :  { %v3616_v7 = vor.u32 %v3953_v62, %v3613_v63  ;;  %v3504_v62 = vor.u32 %v3925_v54, %v3501_v46  ;;  %v3768_v63 = vld [vmem:[#allocation4 + $0x98] sm:$0xf0]  ;;  %v3229_v54 = vld [vmem:[#allocation4 + $0x374] sm:$0xf0] }
 0x14f   :  { %2232 = vmatpush.bf16.msrb.mxu0 %v2916_v6  ;;  %2208 = vmatpush.bf16.msra.mxu2 %v3248_v18  ;;  %v3056_v6 = vor.u32 %v3813_v60, %v3053_v61  ;;  %v2976_v18 = vor.u32 %v3796_v10, %v2975_v9  ;;  %v2863_v61 = vld [vmem:[#allocation4 + $0x80] sm:$0xf]  ;;  %v3675_v9 = vld [vmem:[#allocation4 + $0x6d8] sm:$0xf]  ;;  %v3971_v10 = vld [vmem:[#allocation4 + $0x6f0] sm:$0xf0] }
 0x150   :  { %v3676_v17 = vor.u32 %v3971_v10, %v3675_v9  ;;  %v3283_v9 = vld [vmem:[#allocation4 + $0x3c8] sm:$0xf]  ;;  %v3873_v10 = vld [vmem:[#allocation4 + $0x3e0] sm:$0xf0] }
 0x151   :  { %2245 = vmatpush.bf16.msrb.mxu1 %v3168_v0  ;;  %2221 = vmatpush.bf16.msra.mxu3 %v3500_v24  ;;  %v3336_v0 = vor.u32 %v3883_v4, %v3333_v5  ;;  %v3789_v24 = vld [vmem:[#allocation4 + $0x140] sm:$0xf0]  ;;  %v3918_v4 = vld [vmem:[#allocation4 + $0x54c] sm:$0xf]  ;;  %v3473_v5 = vld [vmem:[#allocation4 + $0x564] sm:$0xf0] }
 0x152   :  { %2209 = vmatmul.bf16.vlgmr.msra.gmra.mxu2 %v4166_v43  ;;  %v2948_v32 = vor.u32 %v3789_v24, %v2947_v23  ;;  %v3964_v23 = vld [vmem:[#allocation4 + $0x6b8] sm:$0xf0] }
 0x153   :  { %2233 = vmatpush.bf16.msrb.mxu0 %v2888_v21  ;;  %2257 = vmatpush.bf16.msrb.mxu2 %v3448_v22  ;;  %v3028_v21 = vor.u32 %v3806_v11, %v3025_v12  ;;  %v3588_v22 = vor.u32 %v3946_v13, %v3585_v14  ;;  %v2864_v11 = vor.u32 %v3768_v63, %v2863_v61  ;;  %v2835_v14 = vld [vmem:[#allocation4 + $0x48] sm:$0xf]  ;;  %v3786_v61 = vld [vmem:[#allocation4 + $0x12c] sm:$0xf] }
 0x154   :  { %v3476_v13 = vor.u32 %v3918_v4, %v3473_v5  ;;  %v2949_v63 = vld [vmem:[#allocation4 + $0x144] sm:$0xf0]  ;;  %v3201_v4 = vld [vmem:[#allocation4 + $0x33c] sm:$0xf0] }
 0x155   :  { %2246 = vmatpush.bf16.msrb.mxu1 %v3140_v28  ;;  %2222 = vmatpush.bf16.msra.mxu3 %v3472_v29  ;;  %v3308_v28 = vor.u32 %v3876_v19, %v3305_v20  ;;  %v3932_v29 = vld [vmem:[#allocation4 + $0x5bc] sm:$0xf]  ;;  %v3901_v19 = vld [vmem:[#allocation4 + $0x4c0] sm:$0xf0]  ;;  %v3087_v20 = vld [vmem:[#allocation4 + $0x240] sm:$0xf] }
 0x156   :  { %v3532_v50 = vor.u32 %v3932_v29, %v3529_v39 }
 0x157   :  { %2234 = vmatpush.bf16.msrb.mxu0 %v2860_v36  ;;  %2258 = vmatpush.bf16.msrb.mxu2 %v3420_v37  ;;  %v2919_v36 = vld [vmem:[#allocation4 + $0xf0] sm:$0xf]  ;;  %v3782_v37 = vld [vmem:[#allocation4 + $0x108] sm:$0xf0] }
 0x158   :  { %2223 = vmatmul.bf16.vlgmr.msra.gmra.mxu3 %v4170_v8 }
 0x159   :  { %2247 = vmatpush.bf16.msrb.mxu1 %v3112_v42  ;;  %2271 = vmatpush.bf16.msrb.mxu3 %v3672_v44  ;;  %v3845_v42 = vld [vmem:[#allocation4 + $0x300] sm:$0xf0]  ;;  %v2920_v44 = vor.u32 %v3782_v37, %v2919_v36  ;;  %v3619_v37 = vld [vmem:[#allocation4 + $0x668] sm:$0xf] }
 0x15a   :  { %v3172_v45 = vor.u32 %v3845_v42, %v3171_v41  ;;  %v3817_v36 = vld [vmem:[#allocation4 + $0x220] sm:$0xf0]  ;;  %v3339_v41 = vld [vmem:[#allocation4 + $0x438] sm:$0xf]  ;;  %v3887_v42 = vld [vmem:[#allocation4 + $0x450] sm:$0xf0] }
 0x15b   :  { %2235 = vmatpush.bf16.msrb.mxu0 %v2832_v51  ;;  %2259 = vmatpush.bf16.msrb.mxu2 %v3392_v52  ;;  %v3775_v51 = vld [vmem:[#allocation4 + $0xd0] sm:$0xf0]  ;;  %v3451_v52 = vld [vmem:[#allocation4 + $0x518] sm:$0xf]  ;;  %v3340_v46 = vor.u32 %v3887_v42, %v3339_v41  ;;  %v3479_v41 = vld [vmem:[#allocation4 + $0x550] sm:$0xf] }
 0x15c   :  { %v2892_v59 = vor.u32 %v3775_v51, %v2891_v49  ;;  %v3452_v60 = vor.u32 %v3915_v53, %v3451_v52  ;;  %v2977_v49 = vld [vmem:[#allocation4 + $0x17c] sm:$0xf0]  ;;  %v3810_v51 = vld [vmem:[#allocation4 + $0x1e8] sm:$0xf0]  ;;  %v3591_v52 = vld [vmem:[#allocation4 + $0x630] sm:$0xf] }
 0x15d   :  { %2248 = vmatpush.bf16.msrb.mxu1 %v3084_v55  ;;  %2272 = vmatpush.bf16.msrb.mxu3 %v3644_v56  ;;  %v3252_v55 = vor.u32 %v3862_v47, %v3249_v48  ;;  %v3143_v56 = vld [vmem:[#allocation4 + $0x2b0] sm:$0xf]  ;;  %v3793_v48 = vld [vmem:[#allocation4 + $0x164] sm:$0xf]  ;;  %v3950_v53 = vld [vmem:[#allocation4 + $0x648] sm:$0xf0] }
 0x15e   :  { %v3922_v42 = vld [vmem:[#allocation4 + $0x568] sm:$0xf0] }
 0x15f   :  { %2236 = vmatpush.bf16.msrb.mxu0 %v2804_v1  ;;  %2260 = vmatpush.bf16.msrb.mxu2 %v3364_v2  ;;  %v3423_v1 = vld [vmem:[#allocation4 + $0x4e0] sm:$0xf]  ;;  %v3908_v2 = vld [vmem:[#allocation4 + $0x4f8] sm:$0xf0] }
 0x160   :  { %v3424_v12 = vor.u32 %v3908_v2, %v3423_v1  ;;  %v3563_v1 = vld [vmem:[#allocation4 + $0x5f8] sm:$0xf]  ;;  %v3943_v2 = vld [vmem:[#allocation4 + $0x610] sm:$0xf0] }
 0x161   :  { %2249 = vmatpush.bf16.msrb.mxu1 %v3056_v6  ;;  %2273 = vmatpush.bf16.msrb.mxu3 %v3616_v7  ;;  %v3115_v6 = vld [vmem:[#allocation4 + $0x278] sm:$0xf]  ;;  %v3831_v7 = vld [vmem:[#allocation4 + $0x290] sm:$0xf0] }
 0x162   :  { %2237 = vmatmul.bf16.vlgmr.msrb.gmra.mxu0 %v4158_v58  ;;  %v3116_v16 = vor.u32 %v3831_v7, %v3115_v6  ;;  %v2952_v6 = vor.u32 %v3786_v61, %v2949_v63  ;;  %v3564_v7 = vor.u32 %v3943_v2, %v3563_v1  ;;  %v3649_v61 = vld [vmem:[#allocation4 + $0x6bc] sm:$0xf0]  ;;  %v3751_v63 = vld [vmem:[#allocation4 + $0x14] sm:$0xf] }
 0x163   :  { %2285 = vmatpush.bf16.msra.mxu0 %v3004_v3  ;;  %2261 = vmatpush.bf16.msrb.mxu2 %v3336_v0  ;;  %v3144_v3 = vor.u32 %v3838_v57, %v3143_v56  ;;  %v3761_v0 = vld [vmem:[#allocation4 + $0x60] sm:$0xf0]  ;;  %v3592_v57 = vor.u32 %v3950_v53, %v3591_v52  ;;  %v3480_v52 = vor.u32 %v3922_v42, %v3479_v41 }
 0x164   :  { %v2836_v24 = vor.u32 %v3761_v0, %v2835_v14  ;;  %v3535_v14 = vld [vmem:[#allocation4 + $0x5c0] sm:$0xf]  ;;  %v3936_v0 = vld [vmem:[#allocation4 + $0x5d8] sm:$0xf0]  ;;  %v3853_v41 = vld [vmem:[#allocation4 + $0x340] sm:$0xf0] }
 0x165   :  { %2250 = vmatpush.bf16.msrb.mxu1 %v3028_v21  ;;  %2274 = vmatpush.bf16.msrb.mxu3 %v3588_v22  ;;  %v3824_v21 = vld [vmem:[#allocation4 + $0x258] sm:$0xf0]  ;;  %v3647_v22 = vld [vmem:[#allocation4 + $0x6a0] sm:$0xf] }
 0x166   :  { %v3088_v31 = vor.u32 %v3824_v21, %v3087_v20  ;;  %v3536_v21 = vor.u32 %v3936_v0, %v3535_v14 }
 0x167   :  { %2286 = vmatpush.bf16.msra.mxu0 %v2976_v18  ;;  %2262 = vmatpush.bf16.msrb.mxu2 %v3308_v28  ;;  %v3395_v18 = vld [vmem:[#allocation4 + $0x4a8] sm:$0xf]  ;;  %v3367_v28 = vld [vmem:[#allocation4 + $0x470] sm:$0xf] }
 0x168   :  { %2251 = vmatmul.bf16.vlgmr.msrb.gmra.mxu1 %v4162_v15  ;;  %v3396_v26 = vor.u32 %v3901_v19, %v3395_v18  ;;  %v3368_v39 = vor.u32 %v3894_v30, %v3367_v28  ;;  %v3284_v18 = vor.u32 %v3873_v10, %v3283_v9  ;;  %v3255_v19 = vld [vmem:[#allocation4 + $0x390] sm:$0xf]  ;;  %v3507_v28 = vld [vmem:[#allocation4 + $0x588] sm:$0xf]  ;;  %v3929_v30 = vld [vmem:[#allocation4 + $0x5a0] sm:$0xf0] }
 0x169   :  { %2299 = vmatpush.bf16.msra.mxu1 %v3228_v25  ;;  %2275 = vmatpush.bf16.msrb.mxu3 %v3560_v35  ;;  %v2807_v25 = vld [vmem:[#allocation4 + $0x10] sm:$0xf]  ;;  %v3059_v35 = vld [vmem:[#allocation4 + $0x208] sm:$0xf]  ;;  %v3804_v9 = vld [vmem:[#allocation4 + $0x1b8] sm:$0xf0] }
 0x16a   :  { %v2808_v29 = vor.u32 %v3754_v27, %v2807_v25  ;;  %v3453_v27 = vld [vmem:[#allocation4 + $0x534] sm:$0xf0]  ;;  %v3814_v10 = vld [vmem:[#allocation4 + $0x20c] sm:$0xf] }
 0x16b   :  { %2287 = vmatpush.bf16.msra.mxu0 %v2948_v32  ;;  %2263 = vmatpush.bf16.msrb.mxu2 %v3280_v40  ;;  %v3648_v32 = vor.u32 %v3964_v23, %v3647_v22  ;;  %v3008_v40 = vor.u32 %v3800_v33, %v3005_v34  ;;  %v3866_v22 = vld [vmem:[#allocation4 + $0x3a8] sm:$0xf0]  ;;  %v3772_v23 = vld [vmem:[#allocation4 + $0xbc] sm:$0xf] }
 0x16c   :  { %v3256_v33 = vor.u32 %v3866_v22, %v3255_v19  ;;  %v3797_v22 = vld [vmem:[#allocation4 + $0x180] sm:$0xf0] }
 0x16d   :  { %2300 = vmatpush.bf16.msra.mxu1 %v3200_v38  ;;  %2276 = vmatpush.bf16.msrb.mxu3 %v3532_v50  ;;  %v3957_v38 = vld [vmem:[#allocation4 + $0x680] sm:$0xf0]  ;;  %v3031_v50 = vld [vmem:[#allocation4 + $0x1d0] sm:$0xf] }
 0x16e   :  { %v3620_v47 = vor.u32 %v3957_v38, %v3619_v37  ;;  %v3032_v56 = vor.u32 %v3810_v51, %v3031_v50  ;;  %v2865_v37 = vld [vmem:[#allocation4 + $0x9c] sm:$0xf0]  ;;  %v3508_v38 = vor.u32 %v3929_v30, %v3507_v28  ;;  %v3860_v28 = vld [vmem:[#allocation4 + $0x378] sm:$0xf0] }
 0x16f   :  { %2288 = vmatpush.bf16.msra.mxu0 %v2920_v44  ;;  %2264 = vmatpush.bf16.msrb.mxu2 %v3252_v55  ;;  %v3060_v44 = vor.u32 %v3817_v36, %v3059_v35  ;;  %v2980_v55 = vor.u32 %v3793_v48, %v2977_v49  ;;  %v3765_v36 = vld [vmem:[#allocation4 + $0x84] sm:$0xf]  ;;  %v3968_v48 = vld [vmem:[#allocation4 + $0x6dc] sm:$0xf]  ;;  %v3677_v49 = vld [vmem:[#allocation4 + $0x6f4] sm:$0xf0] }
 0x170   :  { %v2868_v50 = vor.u32 %v3765_v36, %v2865_v37  ;;  %v2955_v36 = vld [vmem:[#allocation4 + $0x130] sm:$0xf] }
 0x171   :  { %2301 = vmatpush.bf16.msra.mxu1 %v3172_v45  ;;  %2277 = vmatpush.bf16.msrb.mxu3 %v3504_v62  ;;  %v3856_v45 = vld [vmem:[#allocation4 + $0x35c] sm:$0xf] }
 0x172   :  { %2265 = vmatmul.bf16.vlgmr.msrb.gmra.mxu2 %v4166_v43  ;;  %v3232_v62 = vor.u32 %v3856_v45, %v3229_v54  ;;  %v3758_v45 = vld [vmem:[#allocation4 + $0x4c] sm:$0xf]  ;;  %v2837_v54 = vld [vmem:[#allocation4 + $0x64] sm:$0xf0] }
 0x173   :  { %2289 = vmatpush.bf16.msra.mxu0 %v2892_v59  ;;  %2313 = vmatpush.bf16.msra.mxu2 %v3452_v60  ;;  %v3311_v59 = vld [vmem:[#allocation4 + $0x400] sm:$0xf]  ;;  %v3880_v60 = vld [vmem:[#allocation4 + $0x418] sm:$0xf0] }
 0x174   :  { %v3312_v5 = vor.u32 %v3880_v60, %v3311_v59  ;;  %v3089_v59 = vld [vmem:[#allocation4 + $0x25c] sm:$0xf0]  ;;  %v3961_v60 = vld [vmem:[#allocation4 + $0x6a4] sm:$0xf] }
 0x175   :  { %2302 = vmatpush.bf16.msra.mxu1 %v3144_v3  ;;  %2278 = vmatpush.bf16.msrb.mxu3 %v3476_v13  ;;  %v3849_v3 = vld [vmem:[#allocation4 + $0x324] sm:$0xf]  ;;  %v2921_v13 = vld [vmem:[#allocation4 + $0x10c] sm:$0xf0] }
 0x177   :  { %2290 = vmatpush.bf16.msra.mxu0 %v2864_v11  ;;  %2314 = vmatpush.bf16.msra.mxu2 %v3424_v12  ;;  %v3779_v11 = vld [vmem:[#allocation4 + $0xf4] sm:$0xf]  ;;  %v3204_v12 = vor.u32 %v3849_v3, %v3201_v4  ;;  %v2809_v3 = vld [vmem:[#allocation4 + $0x2c] sm:$0xf0] }
 0x178   :  { %2279 = vmatmul.bf16.vlgmr.msrb.gmra.mxu3 %v4170_v8  ;;  %v2924_v20 = vor.u32 %v3779_v11, %v2921_v13  ;;  %v3891_v4 = vld [vmem:[#allocation4 + $0x474] sm:$0xf]  ;;  %v3061_v11 = vld [vmem:[#allocation4 + $0x224] sm:$0xf0]  ;;  %v2812_v14 = vor.u32 %v3751_v63, %v2809_v3  ;;  %v3926_v3 = vld [vmem:[#allocation4 + $0x58c] sm:$0xf] }
 0x179   :  { %2303 = vmatpush.bf16.msra.mxu1 %v3116_v16  ;;  %2327 = vmatpush.bf16.msra.mxu3 %v3676_v17  ;;  %v3842_v16 = vld [vmem:[#allocation4 + $0x2ec] sm:$0xf]  ;;  %v3173_v17 = vld [vmem:[#allocation4 + $0x304] sm:$0xf0]  ;;  %v3064_v19 = vor.u32 %v3814_v10, %v3061_v11 }
 0x17a   :  { %v3176_v25 = vor.u32 %v3842_v16, %v3173_v17  ;;  %v3621_v13 = vld [vmem:[#allocation4 + $0x684] sm:$0xf0]  ;;  %v3884_v17 = vld [vmem:[#allocation4 + $0x43c] sm:$0xf] }
 0x17b   :  { %2291 = vmatpush.bf16.msra.mxu0 %v2836_v24  ;;  %2315 = vmatpush.bf16.msra.mxu2 %v3396_v26  ;;  %v2893_v24 = vld [vmem:[#allocation4 + $0xd4] sm:$0xf0]  ;;  %v3912_v26 = vld [vmem:[#allocation4 + $0x51c] sm:$0xf]  ;;  %v2871_v11 = vld [vmem:[#allocation4 + $0x88] sm:$0xf] }
 0x17c   :  { %v2896_v34 = vor.u32 %v3772_v23, %v2893_v24  ;;  %v3456_v35 = vor.u32 %v3912_v26, %v3453_v27  ;;  %v3807_v23 = vld [vmem:[#allocation4 + $0x1d4] sm:$0xf]  ;;  %v3033_v24 = vld [vmem:[#allocation4 + $0x1ec] sm:$0xf0]  ;;  %v3235_v27 = vld [vmem:[#allocation4 + $0x360] sm:$0xf] }
 0x17d   :  { %2304 = vmatpush.bf16.msra.mxu1 %v3088_v31  ;;  %2328 = vmatpush.bf16.msra.mxu3 %v3648_v32  ;;  %v3835_v31 = vld [vmem:[#allocation4 + $0x2b4] sm:$0xf]  ;;  %v3145_v32 = vld [vmem:[#allocation4 + $0x2cc] sm:$0xf0]  ;;  %v3236_v37 = vor.u32 %v3860_v28, %v3235_v27  ;;  %v3762_v28 = vld [vmem:[#allocation4 + $0x68] sm:$0xf0] }
 0x17e   :  { %v3593_v26 = vld [vmem:[#allocation4 + $0x64c] sm:$0xf0] }
 0x17f   :  { %2292 = vmatpush.bf16.msra.mxu0 %v2808_v29  ;;  %2316 = vmatpush.bf16.msra.mxu2 %v3368_v39  ;;  %v3148_v29 = vor.u32 %v3835_v31, %v3145_v32  ;;  %v3905_v39 = vld [vmem:[#allocation4 + $0x4e4] sm:$0xf]  ;;  %v3036_v32 = vor.u32 %v3807_v23, %v3033_v24  ;;  %v2843_v27 = vld [vmem:[#allocation4 + $0x50] sm:$0xf] }
 0x181   :  { %2305 = vmatpush.bf16.msra.mxu1 %v3060_v44  ;;  %2329 = vmatpush.bf16.msra.mxu3 %v3620_v47  ;;  %v3828_v44 = vld [vmem:[#allocation4 + $0x27c] sm:$0xf]  ;;  %v3117_v47 = vld [vmem:[#allocation4 + $0x294] sm:$0xf0] }
 0x182   :  { %2293 = vmatmul.bf16.vlgmr.msra.gmra.mxu0 %v4158_v58  ;;  %v3120_v53 = vor.u32 %v3828_v44, %v3117_v47 }
 0x183   :  { %2341 = vmatpush.bf16.msrb.mxu0 %v3008_v40  ;;  %2317 = vmatpush.bf16.msra.mxu2 %v3340_v46  ;;  %v3425_v40 = vld [vmem:[#allocation4 + $0x4fc] sm:$0xf0]  ;;  %v3898_v46 = vld [vmem:[#allocation4 + $0x4ac] sm:$0xf] }
 0x184   :  { %v3428_v51 = vor.u32 %v3905_v39, %v3425_v40  ;;  %v3565_v39 = vld [vmem:[#allocation4 + $0x614] sm:$0xf0]  ;;  %v3207_v40 = vld [vmem:[#allocation4 + $0x328] sm:$0xf] }
 0x185   :  { %2306 = vmatpush.bf16.msra.mxu1 %v3032_v56  ;;  %2330 = vmatpush.bf16.msra.mxu3 %v3592_v57  ;;  %v3397_v56 = vld [vmem:[#allocation4 + $0x4c4] sm:$0xf0]  ;;  %v3821_v57 = vld [vmem:[#allocation4 + $0x244] sm:$0xf] }
 0x186   :  { %v3400_v1 = vor.u32 %v3898_v46, %v3397_v56  ;;  %v3092_v2 = vor.u32 %v3821_v57, %v3089_v59  ;;  %v3846_v46 = vld [vmem:[#allocation4 + $0x308] sm:$0xf0]  ;;  %v3863_v56 = vld [vmem:[#allocation4 + $0x394] sm:$0xf] }
 0x187   :  { %2342 = vmatpush.bf16.msrb.mxu0 %v2980_v55  ;;  %2318 = vmatpush.bf16.msra.mxu2 %v3312_v5  ;;  %v3680_v55 = vor.u32 %v3968_v48, %v3677_v49  ;;  %v3369_v5 = vld [vmem:[#allocation4 + $0x48c] sm:$0xf0]  ;;  %v3870_v48 = vld [vmem:[#allocation4 + $0x3cc] sm:$0xf]  ;;  %v3285_v49 = vld [vmem:[#allocation4 + $0x3e4] sm:$0xf0] }
 0x188   :  { %2307 = vmatmul.bf16.vlgmr.msra.gmra.mxu1 %v4162_v15  ;;  %v3372_v0 = vor.u32 %v3891_v4, %v3369_v5  ;;  %v3509_v4 = vld [vmem:[#allocation4 + $0x5a4] sm:$0xf0]  ;;  %v3151_v5 = vld [vmem:[#allocation4 + $0x2b8] sm:$0xf] }
 0x189   :  { %2355 = vmatpush.bf16.msrb.mxu1 %v3232_v62  ;;  %2331 = vmatpush.bf16.msra.mxu3 %v3564_v7  ;;  %v2840_v62 = vor.u32 %v3758_v45, %v2837_v54  ;;  %v3011_v7 = vld [vmem:[#allocation4 + $0x1a0] sm:$0xf]  ;;  %v3179_v54 = vld [vmem:[#allocation4 + $0x2f0] sm:$0xf] }
 0x18a   :  { %v3012_v16 = vor.u32 %v3804_v9, %v3011_v7  ;;  %v3537_v45 = vld [vmem:[#allocation4 + $0x5dc] sm:$0xf0]  ;;  %v3180_v63 = vor.u32 %v3846_v46, %v3179_v54 }
 0x18b   :  { %2343 = vmatpush.bf16.msrb.mxu0 %v2952_v6  ;;  %2319 = vmatpush.bf16.msra.mxu2 %v3284_v18  ;;  %v3652_v6 = vor.u32 %v3961_v60, %v3649_v61  ;;  %v3341_v18 = vld [vmem:[#allocation4 + $0x454] sm:$0xf0]  ;;  %v3257_v60 = vld [vmem:[#allocation4 + $0x3ac] sm:$0xf0]  ;;  %v2899_v61 = vld [vmem:[#allocation4 + $0xc0] sm:$0xf] }
 0x18c   :  { %v3344_v30 = vor.u32 %v3884_v17, %v3341_v18  ;;  %v3260_v7 = vor.u32 %v3863_v56, %v3257_v60  ;;  %v3919_v17 = vld [vmem:[#allocation4 + $0x554] sm:$0xf]  ;;  %v3481_v18 = vld [vmem:[#allocation4 + $0x56c] sm:$0xf0]  ;;  %v3347_v46 = vld [vmem:[#allocation4 + $0x440] sm:$0xf] }
 0x18d   :  { %2356 = vmatpush.bf16.msrb.mxu1 %v3204_v12  ;;  %2332 = vmatpush.bf16.msra.mxu3 %v3536_v21  ;;  %v3954_v12 = vld [vmem:[#allocation4 + $0x66c] sm:$0xf]  ;;  %v2983_v21 = vld [vmem:[#allocation4 + $0x168] sm:$0xf]  ;;  %v3888_v56 = vld [vmem:[#allocation4 + $0x458] sm:$0xf0] }
 0x18e   :  { %v2984_v31 = vor.u32 %v3797_v22, %v2983_v21  ;;  %v3683_v21 = vld [vmem:[#allocation4 + $0x6e0] sm:$0xf]  ;;  %v3972_v22 = vld [vmem:[#allocation4 + $0x6f8] sm:$0xf0] }
 0x18f   :  { %2344 = vmatpush.bf16.msrb.mxu0 %v2924_v20  ;;  %2320 = vmatpush.bf16.msra.mxu2 %v3256_v33  ;;  %v3624_v20 = vor.u32 %v3954_v12, %v3621_v13  ;;  %v3769_v12 = vld [vmem:[#allocation4 + $0xa0] sm:$0xf0]  ;;  %v3512_v13 = vor.u32 %v3926_v3, %v3509_v4 }
 0x190   :  { %v2872_v23 = vor.u32 %v3769_v12, %v2871_v11 }
 0x191   :  { %2357 = vmatpush.bf16.msrb.mxu1 %v3176_v25  ;;  %2333 = vmatpush.bf16.msra.mxu3 %v3508_v38  ;;  %v3947_v25 = vld [vmem:[#allocation4 + $0x634] sm:$0xf]  ;;  %v3790_v38 = vld [vmem:[#allocation4 + $0x148] sm:$0xf0] }
 0x192   :  { %2321 = vmatmul.bf16.vlgmr.msra.gmra.mxu2 %v4166_v43  ;;  %v3596_v33 = vor.u32 %v3947_v25, %v3593_v26  ;;  %v2956_v44 = vor.u32 %v3790_v38, %v2955_v36  ;;  %v3484_v25 = vor.u32 %v3919_v17, %v3481_v18  ;;  %v3965_v36 = vld [vmem:[#allocation4 + $0x6c0] sm:$0xf0]  ;;  %v2844_v38 = vor.u32 %v3762_v28, %v2843_v27  ;;  %v3543_v18 = vld [vmem:[#allocation4 + $0x5c8] sm:$0xf] }
 0x193   :  { %2345 = vmatpush.bf16.msrb.mxu0 %v2896_v34  ;;  %2369 = vmatpush.bf16.msrb.mxu2 %v3456_v35  ;;  %v3877_v34 = vld [vmem:[#allocation4 + $0x404] sm:$0xf]  ;;  %v3313_v35 = vld [vmem:[#allocation4 + $0x41c] sm:$0xf0] }
 0x194   :  { %v3316_v42 = vor.u32 %v3877_v34, %v3313_v35  ;;  %v3825_v34 = vld [vmem:[#allocation4 + $0x260] sm:$0xf0]  ;;  %v3655_v35 = vld [vmem:[#allocation4 + $0x6a8] sm:$0xf] }
 0x195   :  { %2358 = vmatpush.bf16.msrb.mxu1 %v3148_v29  ;;  %2334 = vmatpush.bf16.msra.mxu3 %v3480_v52  ;;  %v3940_v29 = vld [vmem:[#allocation4 + $0x5fc] sm:$0xf]  ;;  %v3783_v52 = vld [vmem:[#allocation4 + $0x110] sm:$0xf0] }
 0x196   :  { %v3568_v47 = vor.u32 %v3940_v29, %v3565_v39 }
 0x197   :  { %2346 = vmatpush.bf16.msrb.mxu0 %v2868_v50  ;;  %2370 = vmatpush.bf16.msrb.mxu2 %v3428_v51  ;;  %v2927_v50 = vld [vmem:[#allocation4 + $0xf8] sm:$0xf]  ;;  %v3208_v51 = vor.u32 %v3853_v41, %v3207_v40  ;;  %v3755_v41 = vld [vmem:[#allocation4 + $0x30] sm:$0xf0] }
 0x198   :  { %2335 = vmatmul.bf16.vlgmr.msra.gmra.mxu3 %v4170_v8  ;;  %v2928_v57 = vor.u32 %v3783_v52, %v2927_v50  ;;  %v2815_v40 = vld [vmem:[#allocation4 + $0x18] sm:$0xf]  ;;  %v3818_v50 = vld [vmem:[#allocation4 + $0x228] sm:$0xf0] }
 0x199   :  { %2359 = vmatpush.bf16.msrb.mxu1 %v3120_v53  ;;  %2383 = vmatpush.bf16.msrb.mxu3 %v3680_v55  ;;  %v3933_v53 = vld [vmem:[#allocation4 + $0x5c4] sm:$0xf]  ;;  %v3288_v55 = vor.u32 %v3870_v48, %v3285_v49  ;;  %v3895_v48 = vld [vmem:[#allocation4 + $0x490] sm:$0xf0]  ;;  %v3067_v49 = vld [vmem:[#allocation4 + $0x210] sm:$0xf] }
 0x19a   :  { %v3540_v59 = vor.u32 %v3933_v53, %v3537_v45  ;;  %v3958_v52 = vld [vmem:[#allocation4 + $0x688] sm:$0xf0]  ;;  %v2816_v53 = vor.u32 %v3755_v41, %v2815_v40  ;;  %v3068_v54 = vor.u32 %v3818_v50, %v3067_v49 }
 0x19b   :  { %2347 = vmatpush.bf16.msrb.mxu0 %v2840_v62  ;;  %2371 = vmatpush.bf16.msrb.mxu2 %v3400_v1  ;;  %v3776_v62 = vld [vmem:[#allocation4 + $0xd8] sm:$0xf0]  ;;  %v3459_v1 = vld [vmem:[#allocation4 + $0x520] sm:$0xf] }
 0x19c   :  { %v2900_v9 = vor.u32 %v3776_v62, %v2899_v61  ;;  %v3599_v61 = vld [vmem:[#allocation4 + $0x638] sm:$0xf]  ;;  %v3951_v62 = vld [vmem:[#allocation4 + $0x650] sm:$0xf0] }
 0x19d   :  { %2360 = vmatpush.bf16.msrb.mxu1 %v3092_v2  ;;  %2384 = vmatpush.bf16.msrb.mxu3 %v3652_v6  ;;  %v3916_v2 = vld [vmem:[#allocation4 + $0x538] sm:$0xf0]  ;;  %v3839_v6 = vld [vmem:[#allocation4 + $0x2d0] sm:$0xf0]  ;;  %v3600_v4 = vor.u32 %v3951_v62, %v3599_v61 }
 0x19e   :  { %v3460_v10 = vor.u32 %v3916_v2, %v3459_v1  ;;  %v4197_v2 = vld [vmem:[%s4241_s6] sm:$0xff] }
 0x19f   :  { %2348 = vmatpush.bf16.msrb.mxu0 %v2812_v14  ;;  %2372 = vmatpush.bf16.msrb.mxu2 %v3372_v0  ;;  %v3152_v14 = vor.u32 %v3839_v6, %v3151_v5  ;;  %v3431_v0 = vld [vmem:[#allocation4 + $0x4e8] sm:$0xf]  ;;  %v3881_v6 = vld [vmem:[#allocation4 + $0x420] sm:$0xf0]  ;;  %v895_v11 = vperm.slane %v4197_v2, 0  ;;  %v896_v28 = vperm.slane %v4197_v2, 1 }
 0x1a0   :  { %v3319_v5 = vld [vmem:[#allocation4 + $0x408] sm:$0xf] }
 0x1a1   :  { %2361 = vmatpush.bf16.msrb.mxu1 %v3064_v19  ;;  %2385 = vmatpush.bf16.msrb.mxu3 %v3624_v20  ;;  %v3123_v19 = vld [vmem:[#allocation4 + $0x280] sm:$0xf]  ;;  %v3832_v20 = vld [vmem:[#allocation4 + $0x298] sm:$0xf0]  ;;  %v3320_v12 = vor.u32 %v3881_v6, %v3319_v5 }
 0x1a2   :  { %2349 = vmatmul.bf16.vlgmr.msrb.gmra.mxu0 %v4158_v58  ;;  %v3124_v26 = vor.u32 %v3832_v20, %v3123_v19  ;;  %v3937_v19 = vld [vmem:[#allocation4 + $0x5e0] sm:$0xf0] }
 0x1a3   :  { %2397 = vmatpush.bf16.msra.mxu0 %v3012_v16  ;;  %2373 = vmatpush.bf16.msrb.mxu2 %v3344_v30  ;;  %v3909_v16 = vld [vmem:[#allocation4 + $0x500] sm:$0xf0]  ;;  %v3403_v30 = vld [vmem:[#allocation4 + $0x4b0] sm:$0xf] }
 0x1a4   :  { %v3432_v24 = vor.u32 %v3909_v16, %v3431_v0  ;;  %v3291_v0 = vld [vmem:[#allocation4 + $0x3d0] sm:$0xf]  ;;  %v3874_v16 = vld [vmem:[#allocation4 + $0x3e8] sm:$0xf0] }
 0x1a5   :  { %2362 = vmatpush.bf16.msrb.mxu1 %v3036_v32  ;;  %2386 = vmatpush.bf16.msrb.mxu3 %v3596_v33  ;;  %v3902_v32 = vld [vmem:[#allocation4 + $0x4c8] sm:$0xf0]  ;;  %v3095_v33 = vld [vmem:[#allocation4 + $0x248] sm:$0xf]  ;;  %v3292_v20 = vor.u32 %v3874_v16, %v3291_v0 }
 0x1a6   :  { %v3404_v29 = vor.u32 %v3902_v32, %v3403_v30  ;;  %v3096_v39 = vor.u32 %v3825_v34, %v3095_v33 }
 0x1a7   :  { %2398 = vmatpush.bf16.msra.mxu0 %v2984_v31  ;;  %2374 = vmatpush.bf16.msrb.mxu2 %v3316_v42  ;;  %v3684_v31 = vor.u32 %v3972_v22, %v3683_v21  ;;  %v3375_v42 = vld [vmem:[#allocation4 + $0x478] sm:$0xf]  ;;  %v3544_v21 = vor.u32 %v3937_v19, %v3543_v18 }
 0x1a8   :  { %2363 = vmatmul.bf16.vlgmr.msrb.gmra.mxu1 %v4162_v15  ;;  %v3376_v45 = vor.u32 %v3895_v48, %v3375_v42  ;;  %v3263_v22 = vld [vmem:[#allocation4 + $0x398] sm:$0xf] }
 0x1a9   :  { %2411 = vmatpush.bf16.msra.mxu1 %v3236_v37  ;;  %2387 = vmatpush.bf16.msrb.mxu3 %v3568_v47  ;;  %v4191_v37 = vpop.f32.mrf.mxu0  ;;  %v3656_v47 = vor.u32 %v3965_v36, %v3655_v35  ;;  %v3487_v35 = vld [vmem:[#allocation4 + $0x558] sm:$0xf]  ;;  %v3923_v36 = vld [vmem:[#allocation4 + $0x570] sm:$0xf0] }
 0x1ab   :  { %2399 = vmatpush.bf16.msra.mxu0 %v2956_v44  ;;  %2375 = vmatpush.bf16.msrb.mxu2 %v3288_v55  ;;  %v2084_v44 = vpop.f32.mrf.mxu1 }
 0x1ad   :  { %2412 = vmatpush.bf16.msra.mxu1 %v3208_v51  ;;  %2388 = vmatpush.bf16.msrb.mxu3 %v3540_v59  ;;  %v3627_v51 = vld [vmem:[#allocation4 + $0x670] sm:$0xf]  ;;  %v3811_v59 = vld [vmem:[#allocation4 + $0x1f0] sm:$0xf0] }
 0x1ae   :  { %v3628_v55 = vor.u32 %v3958_v52, %v3627_v51 }
 0x1af   :  { %2400 = vmatpush.bf16.msra.mxu0 %v2928_v57  ;;  %2376 = vmatpush.bf16.msrb.mxu2 %v3260_v7  ;;  %v3039_v57 = vld [vmem:[#allocation4 + $0x1d8] sm:$0xf]  ;;  %v3571_v7 = vld [vmem:[#allocation4 + $0x600] sm:$0xf] }
 0x1b0   :  { %v3040_v1 = vor.u32 %v3811_v59, %v3039_v57 }
 0x1b1   :  { %2413 = vmatpush.bf16.msra.mxu1 %v3180_v63  ;;  %2389 = vmatpush.bf16.msrb.mxu3 %v3512_v13  ;;  %v3348_v63 = vor.u32 %v3888_v56, %v3347_v46  ;;  %v2072_v3 = vpop.f32.mrf.mxu0 }
 0x1b2   :  { %2377 = vmatmul.bf16.vlgmr.msrb.gmra.mxu2 %v4166_v43 }
 0x1b3   :  { %2401 = vmatpush.bf16.msra.mxu0 %v2900_v9  ;;  %2425 = vmatpush.bf16.msra.mxu2 %v3460_v10  ;;  %v3944_v9 = vld [vmem:[#allocation4 + $0x618] sm:$0xf0]  ;;  %v2086_v10 = vpop.f32.mrf.mxu1 }
 0x1b4   :  { %v2098_v60 = vpop.f32.mrf.mxu2 }
 0x1b5   :  { %2414 = vmatpush.bf16.msra.mxu1 %v3152_v14  ;;  %2390 = vmatpush.bf16.msrb.mxu3 %v3484_v25  ;;  %v3572_v14 = vor.u32 %v3944_v9, %v3571_v7  ;;  %v3515_v25 = vld [vmem:[#allocation4 + $0x590] sm:$0xf] }
 0x1b7   :  { %2402 = vmatpush.bf16.msra.mxu0 %v2872_v23  ;;  %2426 = vmatpush.bf16.msra.mxu2 %v3432_v24  ;;  %v3867_v23 = vld [vmem:[#allocation4 + $0x3b0] sm:$0xf0] }
 0x1b8   :  { %2391 = vmatmul.bf16.vlgmr.msrb.gmra.mxu3 %v4170_v8 }
 0x1b9   :  { %2415 = vmatpush.bf16.msra.mxu1 %v3124_v26  ;;  %2439 = vmatpush.bf16.msra.mxu3 %v3684_v31  ;;  %v3930_v26 = vld [vmem:[#allocation4 + $0x5a8] sm:$0xf0]  ;;  %v2126_v27 = vpop.f32.mrf.mxu0  ;;  %v3264_v31 = vor.u32 %v3867_v23, %v3263_v22  ;;  %v898_v23 = vperm.slane %v4197_v2, 3 }
 0x1ba   :  { %v3516_v33 = vor.u32 %v3930_v26, %v3515_v25 }
 0x1bb   :  { %2403 = vmatpush.bf16.msra.mxu0 %v2844_v38  ;;  %2427 = vmatpush.bf16.msra.mxu2 %v3404_v29  ;;  %v2112_v13 = vpop.f32.mrf.mxu3  ;;  %v2140_v32 = vpop.f32.mrf.mxu1  ;;  %v2073_v38 = vadd.f32 %v2072_v3, %v895_v11  ;;  %v2127_v29 = vadd.f32 %v2126_v27, %v896_v28 }
 0x1bc   :  { %v2100_v17 = vpop.f32.mrf.mxu2 }
 0x1bd   :  { %2416 = vmatpush.bf16.msra.mxu1 %v3096_v39  ;;  %2440 = vmatpush.bf16.msra.mxu3 %v3656_v47  ;;  %v3488_v39 = vor.u32 %v3923_v36, %v3487_v35  ;;  %v2087_v40 = vadd.f32 %v2086_v10, %v2073_v38  ;;  %v2141_v41 = vadd.f32 %v2140_v32, %v2127_v29 }
 0x1bf   :  { %2404 = vmatpush.bf16.msra.mxu0 %v2816_v53  ;;  %2428 = vmatpush.bf16.msra.mxu2 %v3376_v45 }
 0x1c1   :  { %2417 = vmatpush.bf16.msra.mxu1 %v3068_v54  ;;  %2441 = vmatpush.bf16.msra.mxu3 %v3628_v55  ;;  %v2128_v48 = vpop.f32.mrf.mxu0 }
 0x1c2   :  { %2405 = vmatmul.bf16.vlgmr.msra.gmra.mxu0 %v4158_v58  ;;  %v2071_v58 = vadd.f32 %v4191_v37, %v895_v11  ;;  %v2129_v53 = vadd.f32 %v2128_v48, %v896_v28 }
 0x1c3   :  { %2429 = vmatpush.bf16.msra.mxu2 %v3348_v63  ;;  %v2142_v52 = vpop.f32.mrf.mxu1 }
 0x1c4   :  { %v2085_v24 = vadd.f32 %v2084_v44, %v2071_v58  ;;  %v2101_v44 = vadd.f32 %v2100_v17, %v2087_v40  ;;  %v2143_v46 = vadd.f32 %v2142_v52, %v2129_v53  ;;  %v897_v17 = vperm.slane %v4197_v2, 2 }
 0x1c5   :  { %2418 = vmatpush.bf16.msra.mxu1 %v3040_v1  ;;  %2442 = vmatpush.bf16.msra.mxu3 %v3600_v4  ;;  %v2154_v37 = vpop.f32.mrf.mxu2 }
 0x1c6   :  { %v2099_v30 = vadd.f32 %v2098_v60, %v2085_v24  ;;  %v2155_v47 = vadd.f32 %v2154_v37, %v2141_v41 }
 0x1c7   :  { %2430 = vmatpush.bf16.msra.mxu2 %v3320_v12 }
 0x1c8   :  { %2419 = vmatmul.bf16.vlgmr.msra.gmra.mxu1 %v4162_v15  ;;  %v2114_v15 = vpop.f32.mrf.mxu3  ;;  %v2113_v34 = vadd.f32 %v2112_v13, %v2099_v30 }
 0x1c9   :  { %2443 = vmatpush.bf16.msra.mxu3 %v3572_v14  ;;  %v2115_v50 = vadd.f32 %v2114_v15, %v2101_v44  ;;  %v2182_v6 = vpop.f32.mrf.mxu0 }
 0x1ca   :  { %v2453_v42 = vmul.f32 0.5, %v2113_v34  ;;  %v2183_v58 = vadd.f32 %v2182_v6, %v897_v17  ;;  %v899_v6 = vperm.slane %v4197_v2, 4 }
 0x1cb   :  { %2431 = vmatpush.bf16.msra.mxu2 %v3292_v20  ;;  %v2460_v55 = vmul.f32 0.5, %v2115_v50  ;;  %v2196_v9 = vpop.f32.mrf.mxu1 }
 0x1cc   :  { %3984 = vtanh.f32 %v2453_v42  ;;  %v2197_v20 = vadd.f32 %v2196_v9, %v2183_v58 }
 0x1cd   :  { %2444 = vmatpush.bf16.msra.mxu3 %v3544_v21  ;;  %v2156_v54 = vpop.f32.mrf.mxu2 }
 0x1ce   :  { %v2157_v57 = vadd.f32 %v2156_v54, %v2143_v46 }
 0x1cf   :  { %2432 = vmatpush.bf16.msra.mxu2 %v3264_v31 }
 0x1d0   :  { %v2168_v49 = vpop.f32.mrf.mxu3 }
 0x1d1   :  { %2445 = vmatpush.bf16.msra.mxu3 %v3516_v33  ;;  %v2169_v51 = vadd.f32 %v2168_v49, %v2155_v47  ;;  %v2184_v0 = vpop.f32.mrf.mxu0 }
 0x1d2   :  { %2433 = vmatmul.bf16.vlgmr.msra.gmra.mxu2 %v4166_v43  ;;  %v3985_v56 = vpop.eup %3984  ;;  %v2185_v28 = vadd.f32 %v2184_v0, %v897_v17 }
 0x1d3   :  { %v2454_v45 = vmul.f32 0.5, %v2169_v51  ;;  %v2481_v60 = vadd.f32 1.0, %v3985_v56  ;;  %v2198_v18 = vpop.f32.mrf.mxu1 }
 0x1d4   :  { %v2199_v31 = vadd.f32 %v2198_v18, %v2185_v28 }
 0x1d5   :  { %2446 = vmatpush.bf16.msra.mxu3 %v3488_v39  ;;  %3986 = vtanh.f32 %v2454_v45  ;;  %v2495_v1 = vmul.f32 0.5, %v2481_v60  ;;  %v2210_v11 = vpop.f32.mrf.mxu2 }
 0x1d6   :  { %3988 = vtanh.f32 %v2460_v55  ;;  %v2211_v22 = vadd.f32 %v2210_v11, %v2197_v20 }
 0x1d8   :  { %2447 = vmatmul.bf16.vlgmr.msra.gmra.mxu3 %v4170_v8  ;;  %v2170_v43 = vpop.f32.mrf.mxu3 }
 0x1d9   :  { %v2171_v59 = vadd.f32 %v2170_v43, %v2157_v57 }
 0x1db   :  { %v3987_v61 = vpop.eup %3986  ;;  %v2461_v62 = vmul.f32 0.5, %v2171_v59 }
 0x1dc   :  { %v2482_v63 = vadd.f32 1.0, %v3987_v61  ;;  %v3989_v4 = vpop.eup %3988 }
 0x1dd   :  { %3990 = vtanh.f32 %v2461_v62  ;;  %v2488_v8 = vadd.f32 1.0, %v3989_v4  ;;  %v2212_v19 = vpop.f32.mrf.mxu2 }
 0x1de   :  { %v2496_v3 = vmul.f32 0.5, %v2482_v63  ;;  %v2213_v33 = vadd.f32 %v2212_v19, %v2199_v31 }
 0x1df   :  { %v2502_v12 = vmul.f32 0.5, %v2488_v8  ;;  %v2238_v21 = vpop.f32.mrf.mxu0 }
 0x1e0   :  { %v2509_v5 = vpack.c.bf16 %v2496_v3, %v2495_v1  ;;  %v2224_v16 = vpop.f32.mrf.mxu3  ;;  %v2239_v30 = vadd.f32 %v2238_v21, %v898_v23 }
 0x1e1   :  { %v2225_v26 = vadd.f32 %v2224_v16, %v2211_v22 }
 0x1e2   :  { %2517 = vst [vmem:[%s4242_s7] sm:$0xff] %v2509_v5 }
 0x1e3   :  { %v3991_v7 = vpop.eup %3990  ;;  %v2455_v32 = vmul.f32 0.5, %v2225_v26 }
 0x1e4   :  { %v2489_v10 = vadd.f32 1.0, %v3991_v7 }
 0x1e5   :  { %v2252_v24 = vpop.f32.mrf.mxu1  ;;  %3992 = vtanh.f32 %v2455_v32 }
 0x1e6   :  { %v2503_v13 = vmul.f32 0.5, %v2489_v10  ;;  %v2253_v15 = vadd.f32 %v2252_v24, %v2239_v30 }
 0x1e7   :  { %v2240_v35 = vpop.f32.mrf.mxu0 }
 0x1e8   :  { %v2513_v14 = vpack.c.bf16 %v2503_v13, %v2502_v12  ;;  %v2226_v25 = vpop.f32.mrf.mxu3  ;;  %v2241_v39 = vadd.f32 %v2240_v35, %v898_v23  ;;  %v900_v13 = vperm.slane %v4197_v2, 5 }
 0x1e9   :  { %v2227_v37 = vadd.f32 %v2226_v25, %v2213_v33 }
 0x1ea   :  { %2522 = vst [vmem:[%s4242_s7 + $0x1c] sm:$0xff] %v2513_v14 }
 0x1eb   :  { %v2462_v42 = vmul.f32 0.5, %v2227_v37  ;;  %v3993_v47 = vpop.eup %3992 }
 0x1ec   :  { %v2483_v51 = vadd.f32 1.0, %v3993_v47 }
 0x1ed   :  { %v2254_v29 = vpop.f32.mrf.mxu1 }
 0x1ee   :  { %v2255_v44 = vadd.f32 %v2254_v29, %v2241_v39  ;;  %v2497_v54 = vmul.f32 0.5, %v2483_v51  ;;  %v901_v51 = vperm.slane %v4197_v2, 6 }
 0x1f5   :  { %v2266_v27 = vpop.f32.mrf.mxu2 }
 0x1f6   :  { %v2267_v34 = vadd.f32 %v2266_v27, %v2253_v15 }
 0x1fb   :  { %v2280_v36 = vpop.f32.mrf.mxu3 }
 0x1fc   :  { %v2281_v38 = vadd.f32 %v2280_v36, %v2267_v34 }
 0x1fd   :  { %v2268_v41 = vpop.f32.mrf.mxu2 }
 0x1fe   :  { %v2456_v40 = vmul.f32 0.5, %v2281_v38  ;;  %v2269_v48 = vadd.f32 %v2268_v41, %v2255_v44 }
 0x1ff   :  { %v2294_v63 = vpop.f32.mrf.mxu0 }
 0x200   :  { %3994 = vtanh.f32 %v2456_v40  ;;  %v2295_v9 = vadd.f32 %v2294_v63, %v899_v6 }
 0x201   :  { %3996 = vtanh.f32 %v2462_v42 }
 0x203   :  { %v2282_v49 = vpop.f32.mrf.mxu3 }
 0x204   :  { %v2283_v50 = vadd.f32 %v2282_v49, %v2269_v48 }
 0x205   :  { %v2308_v1 = vpop.f32.mrf.mxu1 }
 0x206   :  { %v3995_v52 = vpop.eup %3994  ;;  %v2463_v53 = vmul.f32 0.5, %v2283_v50  ;;  %v2309_v10 = vadd.f32 %v2308_v1, %v2295_v9 }
 0x207   :  { %v2484_v45 = vadd.f32 1.0, %v3995_v52  ;;  %v3997_v55 = vpop.eup %3996  ;;  %v2296_v4 = vpop.f32.mrf.mxu0 }
 0x208   :  { %3998 = vtanh.f32 %v2463_v53  ;;  %v2490_v57 = vadd.f32 1.0, %v3997_v55  ;;  %v2297_v18 = vadd.f32 %v2296_v4, %v899_v6 }
 0x209   :  { %v2498_v46 = vmul.f32 0.5, %v2484_v45 }
 0x20a   :  { %v2504_v60 = vmul.f32 0.5, %v2490_v57 }
 0x20b   :  { %v2510_v56 = vpack.c.bf16 %v2498_v46, %v2497_v54 }
 0x20d   :  { %2518 = vst [vmem:[%s4242_s7 + $0x8] sm:$0xff] %v2510_v56  ;;  %v2310_v8 = vpop.f32.mrf.mxu1 }
 0x20e   :  { %v3999_v43 = vpop.eup %3998  ;;  %v2311_v58 = vadd.f32 %v2310_v8, %v2297_v18 }
 0x20f   :  { %v2491_v59 = vadd.f32 1.0, %v3999_v43 }
 0x211   :  { %v2505_v61 = vmul.f32 0.5, %v2491_v59 }
 0x213   :  { %v2514_v62 = vpack.c.bf16 %v2505_v61, %v2504_v60 }
 0x215   :  { %2523 = vst [vmem:[%s4242_s7 + $0x24] sm:$0xff] %v2514_v62  ;;  %v2322_v3 = vpop.f32.mrf.mxu2 }
 0x216   :  { %v2323_v12 = vadd.f32 %v2322_v3, %v2309_v10 }
 0x21b   :  { %v2336_v5 = vpop.f32.mrf.mxu3 }
 0x21c   :  { %v2337_v16 = vadd.f32 %v2336_v5, %v2323_v12 }
 0x21d   :  { %v2324_v7 = vpop.f32.mrf.mxu2 }
 0x21e   :  { %v2457_v20 = vmul.f32 0.5, %v2337_v16  ;;  %v2325_v22 = vadd.f32 %v2324_v7, %v2311_v58 }
 0x21f   :  { %v2350_v11 = vpop.f32.mrf.mxu0 }
 0x220   :  { %v2351_v19 = vadd.f32 %v2350_v11, %v900_v13  ;;  %4000 = vtanh.f32 %v2457_v20 }
 0x223   :  { %v2338_v0 = vpop.f32.mrf.mxu3 }
 0x224   :  { %v2339_v26 = vadd.f32 %v2338_v0, %v2325_v22 }
 0x225   :  { %v2364_v14 = vpop.f32.mrf.mxu1 }
 0x226   :  { %v2365_v21 = vadd.f32 %v2364_v14, %v2351_v19  ;;  %v2464_v15 = vmul.f32 0.5, %v2339_v26  ;;  %v4001_v34 = vpop.eup %4000 }
 0x227   :  { %v2352_v24 = vpop.f32.mrf.mxu0  ;;  %v2485_v38 = vadd.f32 1.0, %v4001_v34 }
 0x228   :  { %v2353_v30 = vadd.f32 %v2352_v24, %v900_v13 }
 0x229   :  { %v2499_v41 = vmul.f32 0.5, %v2485_v38 }
 0x22d   :  { %v2366_v28 = vpop.f32.mrf.mxu1 }
 0x22e   :  { %v2367_v33 = vadd.f32 %v2366_v28, %v2353_v30 }
 0x235   :  { %v2378_v17 = vpop.f32.mrf.mxu2 }
 0x236   :  { %v2379_v23 = vadd.f32 %v2378_v17, %v2365_v21 }
 0x23b   :  { %v2392_v25 = vpop.f32.mrf.mxu3 }
 0x23c   :  { %v2393_v27 = vadd.f32 %v2392_v25, %v2379_v23 }
 0x23d   :  { %v2380_v32 = vpop.f32.mrf.mxu2 }
 0x23e   :  { %v2458_v31 = vmul.f32 0.5, %v2393_v27  ;;  %v2381_v35 = vadd.f32 %v2380_v32, %v2367_v33 }
 0x23f   :  { %v2406_v50 = vpop.f32.mrf.mxu0 }
 0x240   :  { %4002 = vtanh.f32 %v2458_v31  ;;  %v2407_v46 = vadd.f32 %v2406_v50, %v901_v51 }
 0x241   :  { %4004 = vtanh.f32 %v2464_v15 }
 0x243   :  { %v2394_v36 = vpop.f32.mrf.mxu3 }
 0x244   :  { %v2395_v37 = vadd.f32 %v2394_v36, %v2381_v35 }
 0x245   :  { %v2420_v53 = vpop.f32.mrf.mxu1 }
 0x246   :  { %v4003_v29 = vpop.eup %4002  ;;  %v2465_v39 = vmul.f32 0.5, %v2395_v37  ;;  %v2421_v57 = vadd.f32 %v2420_v53, %v2407_v46 }
 0x247   :  { %v2486_v40 = vadd.f32 1.0, %v4003_v29  ;;  %v4005_v44 = vpop.eup %4004  ;;  %v2408_v59 = vpop.f32.mrf.mxu0 }
 0x248   :  { %4006 = vtanh.f32 %v2465_v39  ;;  %v2492_v48 = vadd.f32 1.0, %v4005_v44  ;;  %v2409_v63 = vadd.f32 %v2408_v59, %v901_v51 }
 0x249   :  { %v2500_v42 = vmul.f32 0.5, %v2486_v40 }
 0x24a   :  { %v2506_v45 = vmul.f32 0.5, %v2492_v48 }
 0x24b   :  { %v2511_v47 = vpack.c.bf16 %v2500_v42, %v2499_v41 }
 0x24d   :  { %2519 = vst [vmem:[%s4242_s7 + $0x10] sm:$0xff] %v2511_v47  ;;  %v2422_v62 = vpop.f32.mrf.mxu1 }
 0x24e   :  { %v4007_v49 = vpop.eup %4006  ;;  %v2423_v3 = vadd.f32 %v2422_v62, %v2409_v63 }
 0x24f   :  { %v2493_v52 = vadd.f32 1.0, %v4007_v49 }
 0x251   :  { %v2507_v54 = vmul.f32 0.5, %v2493_v52 }
 0x253   :  { %v2515_v55 = vpack.c.bf16 %v2507_v54, %v2506_v45 }
 0x255   :  { %v2434_v56 = vpop.f32.mrf.mxu2  ;;  %2524 = vst [vmem:[%s4242_s7 + $0x2c] sm:$0xff] %v2515_v55 }
 0x256   :  { %v2435_v43 = vadd.f32 %v2434_v56, %v2421_v57 }
 0x25b   :  { %v2448_v60 = vpop.f32.mrf.mxu3 }
 0x25c   :  { %v2449_v61 = vadd.f32 %v2448_v60, %v2435_v43 }
 0x25d   :  { %v2436_v2 = vpop.f32.mrf.mxu2 }
 0x25e   :  { %v2459_v1 = vmul.f32 0.5, %v2449_v61  ;;  %v2437_v4 = vadd.f32 %v2436_v2, %v2423_v3 }
 0x260   :  { %4008 = vtanh.f32 %v2459_v1 }
 0x263   :  { %v2450_v5 = vpop.f32.mrf.mxu3 }
 0x264   :  { %v2451_v6 = vadd.f32 %v2450_v5, %v2437_v4 }
 0x266   :  { %v4009_v8 = vpop.eup %4008  ;;  %v2466_v7 = vmul.f32 0.5, %v2451_v6 }
 0x267   :  { %v2487_v9 = vadd.f32 1.0, %v4009_v8 }
 0x268   :  { %4010 = vtanh.f32 %v2466_v7 }
 0x269   :  { %v2501_v10 = vmul.f32 0.5, %v2487_v9 }
 0x26b   :  { %v2512_v11 = vpack.c.bf16 %v2501_v10, %v2501_v10 }
 0x26d   :  { %2521 = vst.msk [vmem:[%s4242_s7 + $0x18] sm:$0xf] %vm2520_vm0, %v2512_v11 }
 0x26e   :  { %v4011_v12 = vpop.eup %4010 }
 0x26f   :  { %v2494_v13 = vadd.f32 1.0, %v4011_v12 }
 0x271   :  { %v2508_v14 = vmul.f32 0.5, %v2494_v13 }
 0x273   :  { %v2516_v0 = vpack.c.bf16 %v2508_v14, %v2508_v14 }
 0x275   :  { %2525 = vst.msk [vmem:[%s4242_s7 + $0x34] sm:$0xf] %vm2520_vm0, %v2516_v0 }
 0x276   :  { %2530 = vsyncpa [#allocation3], 1 }
 0x277   :  { %2531 = vsyncpa [#allocation5], 1 }

</bundles_post_ra>
